<compile_context>
chip_gen: v6e
topology: v6e:2x2x1
jax: 0.10.0
libtpu: 0.0.40
codegen_flags: <defaults>
</compile_context>

<pallas_src>
import jax
import jax.numpy as jnp
from jax.experimental import pallas as pl
from jax.experimental.pallas import tpu as pltpu


def _sliding_max_w(r, k):
    """End-anchored sliding max along the sublane (W) axis via log2(k) doubling.

    Returns g with g[e] = max(r[e-k+1 .. e]) for e >= k-1; rows e < k-1 hold
    wrapped-around garbage and are masked out by the caller.  pltpu.roll follows
    jnp.roll semantics (result[i] = x[i - shift]), so positive shifts pull from
    lower indices and land on the XLU slot instead of unaligned value slices.
    """
    g = r
    span = 1
    while span * 2 <= k:
        g = jnp.maximum(g, pltpu.roll(g, span, axis=0))
        span *= 2
    if span < k:  # combine two power-of-two spans (they overlap since 2*span > k)
        g = jnp.maximum(g, pltpu.roll(g, k - span, axis=0))
    return g


def _make_pool_sum_kernel(H, W, L, groups, grouped_grid):
    """Builds the kernel.

    groups: list (one per grid step along the optional group axis) of lists of
      (out_slot, kernel, stride).  For each entry it computes, per lane c,
        out[out_slot, 0, c] = sum over all valid pooling windows of
                              max over the (kernel x kernel) window of x[:, :, c]
      with MaxPool2d VALID / floor semantics.
    """

    def _emit_group(entries, x_ref, out_ref, row_idx):
        for slot, k, s in entries:
            out_h = (H - k) // s + 1        # number of valid H windows
            acc = jnp.zeros((W, L), jnp.float32)
            for ih in range(out_h):
                h0 = ih * s
                # --- max along H: elementwise maxima of (W, L) row slabs (VPU) ---
                r = x_ref[h0].astype(jnp.float32)
                for d in range(1, k):
                    r = jnp.maximum(r, x_ref[h0 + d].astype(jnp.float32))
                # --- sliding max along W: log2(k) doubling with pltpu.roll ---
                acc = acc + _sliding_max_w(r, k)
            # Single static window-start mask + one sublane reduction at the end.
            start = row_idx - (k - 1)        # window start for end-anchored row e
            keep = jnp.logical_and(start >= 0, start % s == 0)
            out_ref[slot] = jnp.sum(jnp.where(keep, acc, 0.0), axis=0, keepdims=True)

    def kernel(x_ref, out_ref):
        row_idx = jax.lax.broadcasted_iota(jnp.int32, (W, L), 0)
        if not grouped_grid:
            _emit_group(groups[0], x_ref, out_ref, row_idx)
        else:
            gid = pl.program_id(1)
            for g, entries in enumerate(groups):
                @pl.when(gid == g)
                def _(entries=entries):
                    _emit_group(entries, x_ref, out_ref, row_idx)

    return kernel


def _multi_tensorcore_chip():
    """True on chips with 2 TensorCores (megacore) where grid parallelism pays."""
    try:
        kind = jax.devices()[0].device_kind.lower()
    except Exception:
        return False
    return any(tag in kind for tag in ("v7", "v4", "v3"))


def topological_pooling_loss(pred, target, start_channel=1,
                             kernel_list=None, stride_list=None):
    """JAX/Pallas equivalent of TopologicalPoolingLoss.forward for 4D inputs."""
    kernel_list = list(kernel_list) if kernel_list is not None else [4, 5, 8, 10, 20]
    stride_list = list(stride_list) if stride_list is not None else list(kernel_list)

    if pred.ndim != target.ndim:
        raise ValueError("'input' and 'target' have different number of dimensions")
    if pred.ndim != 4:
        # TODO(synk): 5D (NCDHW) path not implemented in the kernel.
        raise ValueError("only the 4D (NCHW) path is implemented in this kernel")
    if pred.shape != target.shape:
        raise ValueError("'input' and 'target' must have the same shape")

    N, C, H, W = pred.shape
    for k in kernel_list:
        if k > H or k > W:
            raise ValueError(f"pooling kernel {k} larger than spatial dims ({H},{W})")

    num_k = len(kernel_list)
    NC = N * C
    LANE = 128

    # Relayout + lane-pack pred and target side by side: (H, W, 2*N*C).
    pred_t = jnp.transpose(pred, (2, 3, 0, 1)).reshape(H, W, NC)
    targ_t = jnp.transpose(target, (2, 3, 0, 1)).reshape(H, W, NC)
    x = jnp.concatenate([pred_t, targ_t], axis=-1)
    L_total = 2 * NC

    if L_total <= LANE:
        lane_tile, lane_pad = L_total, L_total           # full-dim lane block
    else:
        lane_pad = ((L_total + LANE - 1) // LANE) * LANE  # pad to lane multiple
        lane_tile = LANE
        if lane_pad != L_total:
            x = jnp.pad(x, ((0, 0), (0, 0), (0, lane_pad - L_total)))
    nc_tiles = lane_pad // lane_tile

    # Kernel-size grouping: fold everything into one invocation per lane tile
    # (single-TC chips / enough lane tiles); split into 2 grid groups only when
    # a 2-TensorCore chip would otherwise have a single grid step.
    entries = list(zip(kernel_list, stride_list))
    if nc_tiles == 1 and num_k > 1 and _multi_tensorcore_chip():
        num_groups = 2
    else:
        num_groups = 1
    group_rows = -(-num_k // num_groups)                  # ceil division
    groups = []
    for g in range(num_groups):
        chunk = entries[g * group_rows:(g + 1) * group_rows]
        groups.append([(j, k, s) for j, (k, s) in enumerate(chunk)])
    out_rows = num_groups * group_rows                    # may include pad rows
    grouped = num_groups > 1

    kern = _make_pool_sum_kernel(H, W, lane_tile, groups, grouped)

    # Scoped-VMEM budget: never clamp below the actual double-buffered need.
    itemsize = jnp.dtype(x.dtype).itemsize
    in_block = H * W * lane_tile * itemsize
    out_block = group_rows * lane_tile * 4
    need = 2 * in_block + 2 * out_block + (2 << 20)
    vmem_limit = int(min(max(need, 32 * 2**20), 128 * 2**20))

    if grouped:
        grid = (nc_tiles, num_groups)
        in_specs = [pl.BlockSpec((H, W, lane_tile), lambda t, g: (0, 0, t))]
        out_specs = pl.BlockSpec((group_rows, 1, lane_tile), lambda t, g: (g, 0, t))
        dims = ("parallel", "parallel")
    else:
        grid = (nc_tiles,)
        in_specs = [pl.BlockSpec((H, W, lane_tile), lambda t: (0, 0, t))]
        out_specs = pl.BlockSpec((out_rows, 1, lane_tile), lambda t: (0, 0, t))
        dims = ("parallel",)

    sums = pl.pallas_call(
        kern,
        out_shape=jax.ShapeDtypeStruct((out_rows, 1, lane_pad), jnp.float32),
        grid=grid,
        in_specs=in_specs,
        out_specs=out_specs,
        compiler_params=pltpu.CompilerParams(
            dimension_semantics=dims,
            vmem_limit_bytes=vmem_limit),
    )(x)

    # Tiny glue, replicating torch's nested mean order (the mean over the
    # num_dims spatial "dims" is the identity for 4D inputs — identical 2D
    # pooling per dim).
    d = sums[:num_k, 0, :]                               # (num_k, lane_pad)
    p_sums = d[:, :NC].reshape(num_k, N, C)
    t_sums = d[:, NC:2 * NC].reshape(num_k, N, C)
    diff = jnp.abs(p_sums - t_sums)                      # (num_k, N, C)
    per_k = jnp.mean(diff[:, :, start_channel:].reshape(num_k, -1), axis=1)
    return jnp.mean(per_k)


def _reference_loss(pred, target, kernel_list, stride_list, start_channel):
    """Pure-JAX reference using lax.reduce_window (matches torch MaxPool2d)."""
    num_dims = pred.ndim - 2
    ks_means = []
    for k, s in zip(kernel_list, stride_list):
        def pool_sum(x):
            pooled = jax.lax.reduce_window(
                x, -jnp.inf, jax.lax.max,
                window_dimensions=(1, 1, k, k),
                window_strides=(1, 1, s, s),
                padding="VALID")
            return jnp.sum(pooled, axis=(-2, -1))
        diff = jnp.abs(pool_sum(pred) - pool_sum(target))  # (N, C)
        m = jnp.mean(diff[:, start_channel:])
        ks_means.append(jnp.mean(jnp.stack([m] * num_dims)))
    return jnp.mean(jnp.stack(ks_means))


if __name__ == "__main__":
    # Spatial size 20 so the default kernel list [4, 5, 8, 10, 20] is valid
    # (required by the PyTorch module as well).
    N, C, H, W = 2, 4, 20, 20
    key = jax.random.PRNGKey(0)
    k1, k2 = jax.random.split(key)
    pred = jax.random.uniform(k1, (N, C, H, W), dtype=jnp.float32)
    target = (jax.random.uniform(k2, (N, C, H, W), dtype=jnp.float32) > 0.5).astype(jnp.float32)

    loss_fn = jax.jit(lambda p, t: topological_pooling_loss(p, t))
    loss = loss_fn(pred, target)
    jax.block_until_ready(loss)

    ref = _reference_loss(pred, target, [4, 5, 8, 10, 20], [4, 5, 8, 10, 20], 1)
    assert bool(jnp.allclose(loss, ref, rtol=1e-5, atol=1e-5)), (loss, ref)

    print("KERNEL_OK")
</pallas_src>

<mosaic_0001>
module attributes {stable_mosaic.version = 11 : i64} {
  func.func @kernel(%arg0: i32, %arg1: memref<20x20x16xf32, #tpu.memory_space<vmem>>, %arg2: memref<5x1x16xf32, #tpu.memory_space<vmem>>) attributes {dimension_semantics = [#tpu.dimension_semantics<parallel>], iteration_bounds = array<i64: 1>, scalar_prefetch = 0 : i64, scratch_operands = 0 : i64, tpu.core_type = #tpu.core_type<tc>, window_params = [{transform_indices = @transform_0, window_bounds = array<i64: 20, 20, 16>}, {transform_indices = @transform_1, window_bounds = array<i64: 5, 1, 16>}]} {
    %0 = tpu.iota {dimensions = array<i32: 0>} : vector<20x16xi32>
    %cst = arith.constant 0.000000e+00 : f32
    %1 = vector.broadcast %cst : f32 to vector<20x16xf32>
    %c0 = arith.constant 0 : index
    %c0_0 = arith.constant 0 : index
    %c0_1 = arith.constant 0 : index
    %2 = vector.load %arg1[%c0, %c0_0, %c0_1] : memref<20x20x16xf32, #tpu.memory_space<vmem>>, vector<1x20x16xf32>
    %3 = vector.shape_cast %2 : vector<1x20x16xf32> to vector<20x16xf32>
    %c1 = arith.constant 1 : index
    %c0_2 = arith.constant 0 : index
    %c0_3 = arith.constant 0 : index
    %4 = vector.load %arg1[%c1, %c0_2, %c0_3] : memref<20x20x16xf32, #tpu.memory_space<vmem>>, vector<1x20x16xf32>
    %5 = vector.shape_cast %4 : vector<1x20x16xf32> to vector<20x16xf32>
    %6 = arith.maximumf %3, %5 : vector<20x16xf32>
    %c2 = arith.constant 2 : index
    %c0_4 = arith.constant 0 : index
    %c0_5 = arith.constant 0 : index
    %7 = vector.load %arg1[%c2, %c0_4, %c0_5] : memref<20x20x16xf32, #tpu.memory_space<vmem>>, vector<1x20x16xf32>
    %8 = vector.shape_cast %7 : vector<1x20x16xf32> to vector<20x16xf32>
    %9 = arith.maximumf %6, %8 : vector<20x16xf32>
    %c3 = arith.constant 3 : index
    %c0_6 = arith.constant 0 : index
    %c0_7 = arith.constant 0 : index
    %10 = vector.load %arg1[%c3, %c0_6, %c0_7] : memref<20x20x16xf32, #tpu.memory_space<vmem>>, vector<1x20x16xf32>
    %11 = vector.shape_cast %10 : vector<1x20x16xf32> to vector<20x16xf32>
    %12 = arith.maximumf %9, %11 : vector<20x16xf32>
    %c1_i32 = arith.constant 1 : i32
    %13 = tpu.dynamic_rotate %12 by %c1_i32 dim 0 : vector<20x16xf32>, i32 -> vector<20x16xf32>
    %14 = arith.maximumf %12, %13 : vector<20x16xf32>
    %c2_i32 = arith.constant 2 : i32
    %15 = tpu.dynamic_rotate %14 by %c2_i32 dim 0 : vector<20x16xf32>, i32 -> vector<20x16xf32>
    %16 = arith.maximumf %14, %15 : vector<20x16xf32>
    %17 = arith.addf %1, %16 : vector<20x16xf32>
    %c4 = arith.constant 4 : index
    %c0_8 = arith.constant 0 : index
    %c0_9 = arith.constant 0 : index
    %18 = vector.load %arg1[%c4, %c0_8, %c0_9] : memref<20x20x16xf32, #tpu.memory_space<vmem>>, vector<1x20x16xf32>
    %19 = vector.shape_cast %18 : vector<1x20x16xf32> to vector<20x16xf32>
    %c5 = arith.constant 5 : index
    %c0_10 = arith.constant 0 : index
    %c0_11 = arith.constant 0 : index
    %20 = vector.load %arg1[%c5, %c0_10, %c0_11] : memref<20x20x16xf32, #tpu.memory_space<vmem>>, vector<1x20x16xf32>
    %21 = vector.shape_cast %20 : vector<1x20x16xf32> to vector<20x16xf32>
    %22 = arith.maximumf %19, %21 : vector<20x16xf32>
    %c6 = arith.constant 6 : index
    %c0_12 = arith.constant 0 : index
    %c0_13 = arith.constant 0 : index
    %23 = vector.load %arg1[%c6, %c0_12, %c0_13] : memref<20x20x16xf32, #tpu.memory_space<vmem>>, vector<1x20x16xf32>
    %24 = vector.shape_cast %23 : vector<1x20x16xf32> to vector<20x16xf32>
    %25 = arith.maximumf %22, %24 : vector<20x16xf32>
    %c7 = arith.constant 7 : index
    %c0_14 = arith.constant 0 : index
    %c0_15 = arith.constant 0 : index
    %26 = vector.load %arg1[%c7, %c0_14, %c0_15] : memref<20x20x16xf32, #tpu.memory_space<vmem>>, vector<1x20x16xf32>
    %27 = vector.shape_cast %26 : vector<1x20x16xf32> to vector<20x16xf32>
    %28 = arith.maximumf %25, %27 : vector<20x16xf32>
    %c1_i32_16 = arith.constant 1 : i32
    %29 = tpu.dynamic_rotate %28 by %c1_i32_16 dim 0 : vector<20x16xf32>, i32 -> vector<20x16xf32>
    %30 = arith.maximumf %28, %29 : vector<20x16xf32>
    %c2_i32_17 = arith.constant 2 : i32
    %31 = tpu.dynamic_rotate %30 by %c2_i32_17 dim 0 : vector<20x16xf32>, i32 -> vector<20x16xf32>
    %32 = arith.maximumf %30, %31 : vector<20x16xf32>
    %33 = arith.addf %17, %32 : vector<20x16xf32>
    %c8 = arith.constant 8 : index
    %c0_18 = arith.constant 0 : index
    %c0_19 = arith.constant 0 : index
    %34 = vector.load %arg1[%c8, %c0_18, %c0_19] : memref<20x20x16xf32, #tpu.memory_space<vmem>>, vector<1x20x16xf32>
    %35 = vector.shape_cast %34 : vector<1x20x16xf32> to vector<20x16xf32>
    %c9 = arith.constant 9 : index
    %c0_20 = arith.constant 0 : index
    %c0_21 = arith.constant 0 : index
    %36 = vector.load %arg1[%c9, %c0_20, %c0_21] : memref<20x20x16xf32, #tpu.memory_space<vmem>>, vector<1x20x16xf32>
    %37 = vector.shape_cast %36 : vector<1x20x16xf32> to vector<20x16xf32>
    %38 = arith.maximumf %35, %37 : vector<20x16xf32>
    %c10 = arith.constant 10 : index
    %c0_22 = arith.constant 0 : index
    %c0_23 = arith.constant 0 : index
    %39 = vector.load %arg1[%c10, %c0_22, %c0_23] : memref<20x20x16xf32, #tpu.memory_space<vmem>>, vector<1x20x16xf32>
    %40 = vector.shape_cast %39 : vector<1x20x16xf32> to vector<20x16xf32>
    %41 = arith.maximumf %38, %40 : vector<20x16xf32>
    %c11 = arith.constant 11 : index
    %c0_24 = arith.constant 0 : index
    %c0_25 = arith.constant 0 : index
    %42 = vector.load %arg1[%c11, %c0_24, %c0_25] : memref<20x20x16xf32, #tpu.memory_space<vmem>>, vector<1x20x16xf32>
    %43 = vector.shape_cast %42 : vector<1x20x16xf32> to vector<20x16xf32>
    %44 = arith.maximumf %41, %43 : vector<20x16xf32>
    %c1_i32_26 = arith.constant 1 : i32
    %45 = tpu.dynamic_rotate %44 by %c1_i32_26 dim 0 : vector<20x16xf32>, i32 -> vector<20x16xf32>
    %46 = arith.maximumf %44, %45 : vector<20x16xf32>
    %c2_i32_27 = arith.constant 2 : i32
    %47 = tpu.dynamic_rotate %46 by %c2_i32_27 dim 0 : vector<20x16xf32>, i32 -> vector<20x16xf32>
    %48 = arith.maximumf %46, %47 : vector<20x16xf32>
    %49 = arith.addf %33, %48 : vector<20x16xf32>
    %c12 = arith.constant 12 : index
    %c0_28 = arith.constant 0 : index
    %c0_29 = arith.constant 0 : index
    %50 = vector.load %arg1[%c12, %c0_28, %c0_29] : memref<20x20x16xf32, #tpu.memory_space<vmem>>, vector<1x20x16xf32>
    %51 = vector.shape_cast %50 : vector<1x20x16xf32> to vector<20x16xf32>
    %c13 = arith.constant 13 : index
    %c0_30 = arith.constant 0 : index
    %c0_31 = arith.constant 0 : index
    %52 = vector.load %arg1[%c13, %c0_30, %c0_31] : memref<20x20x16xf32, #tpu.memory_space<vmem>>, vector<1x20x16xf32>
    %53 = vector.shape_cast %52 : vector<1x20x16xf32> to vector<20x16xf32>
    %54 = arith.maximumf %51, %53 : vector<20x16xf32>
    %c14 = arith.constant 14 : index
    %c0_32 = arith.constant 0 : index
    %c0_33 = arith.constant 0 : index
    %55 = vector.load %arg1[%c14, %c0_32, %c0_33] : memref<20x20x16xf32, #tpu.memory_space<vmem>>, vector<1x20x16xf32>
    %56 = vector.shape_cast %55 : vector<1x20x16xf32> to vector<20x16xf32>
    %57 = arith.maximumf %54, %56 : vector<20x16xf32>
    %c15 = arith.constant 15 : index
    %c0_34 = arith.constant 0 : index
    %c0_35 = arith.constant 0 : index
    %58 = vector.load %arg1[%c15, %c0_34, %c0_35] : memref<20x20x16xf32, #tpu.memory_space<vmem>>, vector<1x20x16xf32>
    %59 = vector.shape_cast %58 : vector<1x20x16xf32> to vector<20x16xf32>
    %60 = arith.maximumf %57, %59 : vector<20x16xf32>
    %c1_i32_36 = arith.constant 1 : i32
    %61 = tpu.dynamic_rotate %60 by %c1_i32_36 dim 0 : vector<20x16xf32>, i32 -> vector<20x16xf32>
    %62 = arith.maximumf %60, %61 : vector<20x16xf32>
    %c2_i32_37 = arith.constant 2 : i32
    %63 = tpu.dynamic_rotate %62 by %c2_i32_37 dim 0 : vector<20x16xf32>, i32 -> vector<20x16xf32>
    %64 = arith.maximumf %62, %63 : vector<20x16xf32>
    %65 = arith.addf %49, %64 : vector<20x16xf32>
    %c16 = arith.constant 16 : index
    %c0_38 = arith.constant 0 : index
    %c0_39 = arith.constant 0 : index
    %66 = vector.load %arg1[%c16, %c0_38, %c0_39] : memref<20x20x16xf32, #tpu.memory_space<vmem>>, vector<1x20x16xf32>
    %67 = vector.shape_cast %66 : vector<1x20x16xf32> to vector<20x16xf32>
    %c17 = arith.constant 17 : index
    %c0_40 = arith.constant 0 : index
    %c0_41 = arith.constant 0 : index
    %68 = vector.load %arg1[%c17, %c0_40, %c0_41] : memref<20x20x16xf32, #tpu.memory_space<vmem>>, vector<1x20x16xf32>
    %69 = vector.shape_cast %68 : vector<1x20x16xf32> to vector<20x16xf32>
    %70 = arith.maximumf %67, %69 : vector<20x16xf32>
    %c18 = arith.constant 18 : index
    %c0_42 = arith.constant 0 : index
    %c0_43 = arith.constant 0 : index
    %71 = vector.load %arg1[%c18, %c0_42, %c0_43] : memref<20x20x16xf32, #tpu.memory_space<vmem>>, vector<1x20x16xf32>
    %72 = vector.shape_cast %71 : vector<1x20x16xf32> to vector<20x16xf32>
    %73 = arith.maximumf %70, %72 : vector<20x16xf32>
    %c19 = arith.constant 19 : index
    %c0_44 = arith.constant 0 : index
    %c0_45 = arith.constant 0 : index
    %74 = vector.load %arg1[%c19, %c0_44, %c0_45] : memref<20x20x16xf32, #tpu.memory_space<vmem>>, vector<1x20x16xf32>
    %75 = vector.shape_cast %74 : vector<1x20x16xf32> to vector<20x16xf32>
    %76 = arith.maximumf %73, %75 : vector<20x16xf32>
    %c1_i32_46 = arith.constant 1 : i32
    %77 = tpu.dynamic_rotate %76 by %c1_i32_46 dim 0 : vector<20x16xf32>, i32 -> vector<20x16xf32>
    %78 = arith.maximumf %76, %77 : vector<20x16xf32>
    %c2_i32_47 = arith.constant 2 : i32
    %79 = tpu.dynamic_rotate %78 by %c2_i32_47 dim 0 : vector<20x16xf32>, i32 -> vector<20x16xf32>
    %80 = arith.maximumf %78, %79 : vector<20x16xf32>
    %81 = arith.addf %65, %80 : vector<20x16xf32>
    %c3_i32 = arith.constant 3 : i32
    %82 = vector.broadcast %c3_i32 : i32 to vector<20x16xi32>
    %83 = arith.subi %0, %82 : vector<20x16xi32>
    %c0_i32 = arith.constant 0 : i32
    %84 = vector.broadcast %c0_i32 : i32 to vector<20x16xi32>
    %85 = arith.cmpi sge, %83, %84 : vector<20x16xi32>
    %c4_i32 = arith.constant 4 : i32
    %c0_i32_48 = arith.constant 0 : i32
    %86 = arith.cmpi eq, %c4_i32, %c0_i32_48 : i32
    %c1_i32_49 = arith.constant 1 : i32
    %87 = arith.select %86, %c1_i32_49, %c4_i32 : i32
    %88 = vector.broadcast %87 : i32 to vector<20x16xi32>
    %89 = arith.remsi %83, %88 : vector<20x16xi32>
    %c0_i32_50 = arith.constant 0 : i32
    %90 = vector.broadcast %c0_i32_50 : i32 to vector<20x16xi32>
    %91 = arith.cmpi ne, %89, %90 : vector<20x16xi32>
    %c0_i32_51 = arith.constant 0 : i32
    %92 = vector.broadcast %c0_i32_51 : i32 to vector<20x16xi32>
    %93 = arith.cmpi slt, %89, %92 : vector<20x16xi32>
    %c0_i32_52 = arith.constant 0 : i32
    %94 = arith.cmpi slt, %87, %c0_i32_52 : i32
    %95 = vector.broadcast %94 : i1 to vector<20x16xi1>
    %96 = vector.broadcast %95 : vector<20x16xi1> to vector<20x16xi1>
    %97 = arith.xori %93, %96 : vector<20x16xi1>
    %98 = arith.andi %97, %91 : vector<20x16xi1>
    %99 = vector.broadcast %87 : i32 to vector<20x16xi32>
    %100 = arith.addi %89, %99 : vector<20x16xi32>
    %101 = arith.select %98, %100, %89 : vector<20x16xi1>, vector<20x16xi32>
    %c0_i32_53 = arith.constant 0 : i32
    %102 = vector.broadcast %c0_i32_53 : i32 to vector<20x16xi32>
    %103 = arith.cmpi eq, %101, %102 : vector<20x16xi32>
    %104 = arith.andi %85, %103 : vector<20x16xi1>
    %cst_54 = arith.constant 0.000000e+00 : f32
    %105 = vector.broadcast %cst_54 : f32 to vector<20x16xf32>
    %106 = arith.select %104, %81, %105 : vector<20x16xi1>, vector<20x16xf32>
    %cst_55 = arith.constant dense<0.000000e+00> : vector<16xf32>
    %107 = vector.multi_reduction <add>, %106, %cst_55 [0] : vector<20x16xf32> to vector<16xf32>
    %108 = vector.shape_cast %107 : vector<16xf32> to vector<1x16xf32>
    %c0_56 = arith.constant 0 : index
    %c0_57 = arith.constant 0 : index
    %c0_58 = arith.constant 0 : index
    %109 = vector.load %arg2[%c0_56, %c0_57, %c0_58] : memref<5x1x16xf32, #tpu.memory_space<vmem>>, vector<1x1x16xf32>
    %110 = vector.shape_cast %109 : vector<1x1x16xf32> to vector<1x16xf32>
    %111 = vector.shape_cast %108 : vector<1x16xf32> to vector<1x1x16xf32>
    tpu.vector_store %arg2[%c0_56, %c0_57, %c0_58], %111 {strides = array<i32>} : memref<5x1x16xf32, #tpu.memory_space<vmem>>, vector<1x1x16xf32>,
    %cst_59 = arith.constant 0.000000e+00 : f32
    %112 = vector.broadcast %cst_59 : f32 to vector<20x16xf32>
    %c0_60 = arith.constant 0 : index
    %c0_61 = arith.constant 0 : index
    %c0_62 = arith.constant 0 : index
    %113 = vector.load %arg1[%c0_60, %c0_61, %c0_62] : memref<20x20x16xf32, #tpu.memory_space<vmem>>, vector<1x20x16xf32>
    %114 = vector.shape_cast %113 : vector<1x20x16xf32> to vector<20x16xf32>
    %c1_63 = arith.constant 1 : index
    %c0_64 = arith.constant 0 : index
    %c0_65 = arith.constant 0 : index
    %115 = vector.load %arg1[%c1_63, %c0_64, %c0_65] : memref<20x20x16xf32, #tpu.memory_space<vmem>>, vector<1x20x16xf32>
    %116 = vector.shape_cast %115 : vector<1x20x16xf32> to vector<20x16xf32>
    %117 = arith.maximumf %114, %116 : vector<20x16xf32>
    %c2_66 = arith.constant 2 : index
    %c0_67 = arith.constant 0 : index
    %c0_68 = arith.constant 0 : index
    %118 = vector.load %arg1[%c2_66, %c0_67, %c0_68] : memref<20x20x16xf32, #tpu.memory_space<vmem>>, vector<1x20x16xf32>
    %119 = vector.shape_cast %118 : vector<1x20x16xf32> to vector<20x16xf32>
    %120 = arith.maximumf %117, %119 : vector<20x16xf32>
    %c3_69 = arith.constant 3 : index
    %c0_70 = arith.constant 0 : index
    %c0_71 = arith.constant 0 : index
    %121 = vector.load %arg1[%c3_69, %c0_70, %c0_71] : memref<20x20x16xf32, #tpu.memory_space<vmem>>, vector<1x20x16xf32>
    %122 = vector.shape_cast %121 : vector<1x20x16xf32> to vector<20x16xf32>
    %123 = arith.maximumf %120, %122 : vector<20x16xf32>
    %c4_72 = arith.constant 4 : index
    %c0_73 = arith.constant 0 : index
    %c0_74 = arith.constant 0 : index
    %124 = vector.load %arg1[%c4_72, %c0_73, %c0_74] : memref<20x20x16xf32, #tpu.memory_space<vmem>>, vector<1x20x16xf32>
    %125 = vector.shape_cast %124 : vector<1x20x16xf32> to vector<20x16xf32>
    %126 = arith.maximumf %123, %125 : vector<20x16xf32>
    %c1_i32_75 = arith.constant 1 : i32
    %127 = tpu.dynamic_rotate %126 by %c1_i32_75 dim 0 : vector<20x16xf32>, i32 -> vector<20x16xf32>
    %128 = arith.maximumf %126, %127 : vector<20x16xf32>
    %c2_i32_76 = arith.constant 2 : i32
    %129 = tpu.dynamic_rotate %128 by %c2_i32_76 dim 0 : vector<20x16xf32>, i32 -> vector<20x16xf32>
    %130 = arith.maximumf %128, %129 : vector<20x16xf32>
    %c1_i32_77 = arith.constant 1 : i32
    %131 = tpu.dynamic_rotate %130 by %c1_i32_77 dim 0 : vector<20x16xf32>, i32 -> vector<20x16xf32>
    %132 = arith.maximumf %130, %131 : vector<20x16xf32>
    %133 = arith.addf %112, %132 : vector<20x16xf32>
    %c5_78 = arith.constant 5 : index
    %c0_79 = arith.constant 0 : index
    %c0_80 = arith.constant 0 : index
    %134 = vector.load %arg1[%c5_78, %c0_79, %c0_80] : memref<20x20x16xf32, #tpu.memory_space<vmem>>, vector<1x20x16xf32>
    %135 = vector.shape_cast %134 : vector<1x20x16xf32> to vector<20x16xf32>
    %c6_81 = arith.constant 6 : index
    %c0_82 = arith.constant 0 : index
    %c0_83 = arith.constant 0 : index
    %136 = vector.load %arg1[%c6_81, %c0_82, %c0_83] : memref<20x20x16xf32, #tpu.memory_space<vmem>>, vector<1x20x16xf32>
    %137 = vector.shape_cast %136 : vector<1x20x16xf32> to vector<20x16xf32>
    %138 = arith.maximumf %135, %137 : vector<20x16xf32>
    %c7_84 = arith.constant 7 : index
    %c0_85 = arith.constant 0 : index
    %c0_86 = arith.constant 0 : index
    %139 = vector.load %arg1[%c7_84, %c0_85, %c0_86] : memref<20x20x16xf32, #tpu.memory_space<vmem>>, vector<1x20x16xf32>
    %140 = vector.shape_cast %139 : vector<1x20x16xf32> to vector<20x16xf32>
    %141 = arith.maximumf %138, %140 : vector<20x16xf32>
    %c8_87 = arith.constant 8 : index
    %c0_88 = arith.constant 0 : index
    %c0_89 = arith.constant 0 : index
    %142 = vector.load %arg1[%c8_87, %c0_88, %c0_89] : memref<20x20x16xf32, #tpu.memory_space<vmem>>, vector<1x20x16xf32>
    %143 = vector.shape_cast %142 : vector<1x20x16xf32> to vector<20x16xf32>
    %144 = arith.maximumf %141, %143 : vector<20x16xf32>
    %c9_90 = arith.constant 9 : index
    %c0_91 = arith.constant 0 : index
    %c0_92 = arith.constant 0 : index
    %145 = vector.load %arg1[%c9_90, %c0_91, %c0_92] : memref<20x20x16xf32, #tpu.memory_space<vmem>>, vector<1x20x16xf32>
    %146 = vector.shape_cast %145 : vector<1x20x16xf32> to vector<20x16xf32>
    %147 = arith.maximumf %144, %146 : vector<20x16xf32>
    %c1_i32_93 = arith.constant 1 : i32
    %148 = tpu.dynamic_rotate %147 by %c1_i32_93 dim 0 : vector<20x16xf32>, i32 -> vector<20x16xf32>
    %149 = arith.maximumf %147, %148 : vector<20x16xf32>
    %c2_i32_94 = arith.constant 2 : i32
    %150 = tpu.dynamic_rotate %149 by %c2_i32_94 dim 0 : vector<20x16xf32>, i32 -> vector<20x16xf32>
    %151 = arith.maximumf %149, %150 : vector<20x16xf32>
    %c1_i32_95 = arith.constant 1 : i32
    %152 = tpu.dynamic_rotate %151 by %c1_i32_95 dim 0 : vector<20x16xf32>, i32 -> vector<20x16xf32>
    %153 = arith.maximumf %151, %152 : vector<20x16xf32>
    %154 = arith.addf %133, %153 : vector<20x16xf32>
    %c10_96 = arith.constant 10 : index
    %c0_97 = arith.constant 0 : index
    %c0_98 = arith.constant 0 : index
    %155 = vector.load %arg1[%c10_96, %c0_97, %c0_98] : memref<20x20x16xf32, #tpu.memory_space<vmem>>, vector<1x20x16xf32>
    %156 = vector.shape_cast %155 : vector<1x20x16xf32> to vector<20x16xf32>
    %c11_99 = arith.constant 11 : index
    %c0_100 = arith.constant 0 : index
    %c0_101 = arith.constant 0 : index
    %157 = vector.load %arg1[%c11_99, %c0_100, %c0_101] : memref<20x20x16xf32, #tpu.memory_space<vmem>>, vector<1x20x16xf32>
    %158 = vector.shape_cast %157 : vector<1x20x16xf32> to vector<20x16xf32>
    %159 = arith.maximumf %156, %158 : vector<20x16xf32>
    %c12_102 = arith.constant 12 : index
    %c0_103 = arith.constant 0 : index
    %c0_104 = arith.constant 0 : index
    %160 = vector.load %arg1[%c12_102, %c0_103, %c0_104] : memref<20x20x16xf32, #tpu.memory_space<vmem>>, vector<1x20x16xf32>
    %161 = vector.shape_cast %160 : vector<1x20x16xf32> to vector<20x16xf32>
    %162 = arith.maximumf %159, %161 : vector<20x16xf32>
    %c13_105 = arith.constant 13 : index
    %c0_106 = arith.constant 0 : index
    %c0_107 = arith.constant 0 : index
    %163 = vector.load %arg1[%c13_105, %c0_106, %c0_107] : memref<20x20x16xf32, #tpu.memory_space<vmem>>, vector<1x20x16xf32>
    %164 = vector.shape_cast %163 : vector<1x20x16xf32> to vector<20x16xf32>
    %165 = arith.maximumf %162, %164 : vector<20x16xf32>
    %c14_108 = arith.constant 14 : index
    %c0_109 = arith.constant 0 : index
    %c0_110 = arith.constant 0 : index
    %166 = vector.load %arg1[%c14_108, %c0_109, %c0_110] : memref<20x20x16xf32, #tpu.memory_space<vmem>>, vector<1x20x16xf32>
    %167 = vector.shape_cast %166 : vector<1x20x16xf32> to vector<20x16xf32>
    %168 = arith.maximumf %165, %167 : vector<20x16xf32>
    %c1_i32_111 = arith.constant 1 : i32
    %169 = tpu.dynamic_rotate %168 by %c1_i32_111 dim 0 : vector<20x16xf32>, i32 -> vector<20x16xf32>
    %170 = arith.maximumf %168, %169 : vector<20x16xf32>
    %c2_i32_112 = arith.constant 2 : i32
    %171 = tpu.dynamic_rotate %170 by %c2_i32_112 dim 0 : vector<20x16xf32>, i32 -> vector<20x16xf32>
    %172 = arith.maximumf %170, %171 : vector<20x16xf32>
    %c1_i32_113 = arith.constant 1 : i32
    %173 = tpu.dynamic_rotate %172 by %c1_i32_113 dim 0 : vector<20x16xf32>, i32 -> vector<20x16xf32>
    %174 = arith.maximumf %172, %173 : vector<20x16xf32>
    %175 = arith.addf %154, %174 : vector<20x16xf32>
    %c15_114 = arith.constant 15 : index
    %c0_115 = arith.constant 0 : index
    %c0_116 = arith.constant 0 : index
    %176 = vector.load %arg1[%c15_114, %c0_115, %c0_116] : memref<20x20x16xf32, #tpu.memory_space<vmem>>, vector<1x20x16xf32>
    %177 = vector.shape_cast %176 : vector<1x20x16xf32> to vector<20x16xf32>
    %c16_117 = arith.constant 16 : index
    %c0_118 = arith.constant 0 : index
    %c0_119 = arith.constant 0 : index
    %178 = vector.load %arg1[%c16_117, %c0_118, %c0_119] : memref<20x20x16xf32, #tpu.memory_space<vmem>>, vector<1x20x16xf32>
    %179 = vector.shape_cast %178 : vector<1x20x16xf32> to vector<20x16xf32>
    %180 = arith.maximumf %177, %179 : vector<20x16xf32>
    %c17_120 = arith.constant 17 : index
    %c0_121 = arith.constant 0 : index
    %c0_122 = arith.constant 0 : index
    %181 = vector.load %arg1[%c17_120, %c0_121, %c0_122] : memref<20x20x16xf32, #tpu.memory_space<vmem>>, vector<1x20x16xf32>
    %182 = vector.shape_cast %181 : vector<1x20x16xf32> to vector<20x16xf32>
    %183 = arith.maximumf %180, %182 : vector<20x16xf32>
    %c18_123 = arith.constant 18 : index
    %c0_124 = arith.constant 0 : index
    %c0_125 = arith.constant 0 : index
    %184 = vector.load %arg1[%c18_123, %c0_124, %c0_125] : memref<20x20x16xf32, #tpu.memory_space<vmem>>, vector<1x20x16xf32>
    %185 = vector.shape_cast %184 : vector<1x20x16xf32> to vector<20x16xf32>
    %186 = arith.maximumf %183, %185 : vector<20x16xf32>
    %c19_126 = arith.constant 19 : index
    %c0_127 = arith.constant 0 : index
    %c0_128 = arith.constant 0 : index
    %187 = vector.load %arg1[%c19_126, %c0_127, %c0_128] : memref<20x20x16xf32, #tpu.memory_space<vmem>>, vector<1x20x16xf32>
    %188 = vector.shape_cast %187 : vector<1x20x16xf32> to vector<20x16xf32>
    %189 = arith.maximumf %186, %188 : vector<20x16xf32>
    %c1_i32_129 = arith.constant 1 : i32
    %190 = tpu.dynamic_rotate %189 by %c1_i32_129 dim 0 : vector<20x16xf32>, i32 -> vector<20x16xf32>
    %191 = arith.maximumf %189, %190 : vector<20x16xf32>
    %c2_i32_130 = arith.constant 2 : i32
    %192 = tpu.dynamic_rotate %191 by %c2_i32_130 dim 0 : vector<20x16xf32>, i32 -> vector<20x16xf32>
    %193 = arith.maximumf %191, %192 : vector<20x16xf32>
    %c1_i32_131 = arith.constant 1 : i32
    %194 = tpu.dynamic_rotate %193 by %c1_i32_131 dim 0 : vector<20x16xf32>, i32 -> vector<20x16xf32>
    %195 = arith.maximumf %193, %194 : vector<20x16xf32>
    %196 = arith.addf %175, %195 : vector<20x16xf32>
    %c4_i32_132 = arith.constant 4 : i32
    %197 = vector.broadcast %c4_i32_132 : i32 to vector<20x16xi32>
    %198 = arith.subi %0, %197 : vector<20x16xi32>
    %c0_i32_133 = arith.constant 0 : i32
    %199 = vector.broadcast %c0_i32_133 : i32 to vector<20x16xi32>
    %200 = arith.cmpi sge, %198, %199 : vector<20x16xi32>
    %c5_i32 = arith.constant 5 : i32
    %c0_i32_134 = arith.constant 0 : i32
    %201 = arith.cmpi eq, %c5_i32, %c0_i32_134 : i32
    %c1_i32_135 = arith.constant 1 : i32
    %202 = arith.select %201, %c1_i32_135, %c5_i32 : i32
    %203 = vector.broadcast %202 : i32 to vector<20x16xi32>
    %204 = arith.remsi %198, %203 : vector<20x16xi32>
    %c0_i32_136 = arith.constant 0 : i32
    %205 = vector.broadcast %c0_i32_136 : i32 to vector<20x16xi32>
    %206 = arith.cmpi ne, %204, %205 : vector<20x16xi32>
    %c0_i32_137 = arith.constant 0 : i32
    %207 = vector.broadcast %c0_i32_137 : i32 to vector<20x16xi32>
    %208 = arith.cmpi slt, %204, %207 : vector<20x16xi32>
    %c0_i32_138 = arith.constant 0 : i32
    %209 = arith.cmpi slt, %202, %c0_i32_138 : i32
    %210 = vector.broadcast %209 : i1 to vector<20x16xi1>
    %211 = vector.broadcast %210 : vector<20x16xi1> to vector<20x16xi1>
    %212 = arith.xori %208, %211 : vector<20x16xi1>
    %213 = arith.andi %212, %206 : vector<20x16xi1>
    %214 = vector.broadcast %202 : i32 to vector<20x16xi32>
    %215 = arith.addi %204, %214 : vector<20x16xi32>
    %216 = arith.select %213, %215, %204 : vector<20x16xi1>, vector<20x16xi32>
    %c0_i32_139 = arith.constant 0 : i32
    %217 = vector.broadcast %c0_i32_139 : i32 to vector<20x16xi32>
    %218 = arith.cmpi eq, %216, %217 : vector<20x16xi32>
    %219 = arith.andi %200, %218 : vector<20x16xi1>
    %cst_140 = arith.constant 0.000000e+00 : f32
    %220 = vector.broadcast %cst_140 : f32 to vector<20x16xf32>
    %221 = arith.select %219, %196, %220 : vector<20x16xi1>, vector<20x16xf32>
    %cst_141 = arith.constant dense<0.000000e+00> : vector<16xf32>
    %222 = vector.multi_reduction <add>, %221, %cst_141 [0] : vector<20x16xf32> to vector<16xf32>
    %223 = vector.shape_cast %222 : vector<16xf32> to vector<1x16xf32>
    %c1_142 = arith.constant 1 : index
    %c0_143 = arith.constant 0 : index
    %c0_144 = arith.constant 0 : index
    %224 = vector.load %arg2[%c1_142, %c0_143, %c0_144] : memref<5x1x16xf32, #tpu.memory_space<vmem>>, vector<1x1x16xf32>
    %225 = vector.shape_cast %224 : vector<1x1x16xf32> to vector<1x16xf32>
    %226 = vector.shape_cast %223 : vector<1x16xf32> to vector<1x1x16xf32>
    tpu.vector_store %arg2[%c1_142, %c0_143, %c0_144], %226 {strides = array<i32>} : memref<5x1x16xf32, #tpu.memory_space<vmem>>, vector<1x1x16xf32>,
    %cst_145 = arith.constant 0.000000e+00 : f32
    %227 = vector.broadcast %cst_145 : f32 to vector<20x16xf32>
    %c0_146 = arith.constant 0 : index
    %c0_147 = arith.constant 0 : index
    %c0_148 = arith.constant 0 : index
    %228 = vector.load %arg1[%c0_146, %c0_147, %c0_148] : memref<20x20x16xf32, #tpu.memory_space<vmem>>, vector<1x20x16xf32>
    %229 = vector.shape_cast %228 : vector<1x20x16xf32> to vector<20x16xf32>
    %c1_149 = arith.constant 1 : index
    %c0_150 = arith.constant 0 : index
    %c0_151 = arith.constant 0 : index
    %230 = vector.load %arg1[%c1_149, %c0_150, %c0_151] : memref<20x20x16xf32, #tpu.memory_space<vmem>>, vector<1x20x16xf32>
    %231 = vector.shape_cast %230 : vector<1x20x16xf32> to vector<20x16xf32>
    %232 = arith.maximumf %229, %231 : vector<20x16xf32>
    %c2_152 = arith.constant 2 : index
    %c0_153 = arith.constant 0 : index
    %c0_154 = arith.constant 0 : index
    %233 = vector.load %arg1[%c2_152, %c0_153, %c0_154] : memref<20x20x16xf32, #tpu.memory_space<vmem>>, vector<1x20x16xf32>
    %234 = vector.shape_cast %233 : vector<1x20x16xf32> to vector<20x16xf32>
    %235 = arith.maximumf %232, %234 : vector<20x16xf32>
    %c3_155 = arith.constant 3 : index
    %c0_156 = arith.constant 0 : index
    %c0_157 = arith.constant 0 : index
    %236 = vector.load %arg1[%c3_155, %c0_156, %c0_157] : memref<20x20x16xf32, #tpu.memory_space<vmem>>, vector<1x20x16xf32>
    %237 = vector.shape_cast %236 : vector<1x20x16xf32> to vector<20x16xf32>
    %238 = arith.maximumf %235, %237 : vector<20x16xf32>
    %c4_158 = arith.constant 4 : index
    %c0_159 = arith.constant 0 : index
    %c0_160 = arith.constant 0 : index
    %239 = vector.load %arg1[%c4_158, %c0_159, %c0_160] : memref<20x20x16xf32, #tpu.memory_space<vmem>>, vector<1x20x16xf32>
    %240 = vector.shape_cast %239 : vector<1x20x16xf32> to vector<20x16xf32>
    %241 = arith.maximumf %238, %240 : vector<20x16xf32>
    %c5_161 = arith.constant 5 : index
    %c0_162 = arith.constant 0 : index
    %c0_163 = arith.constant 0 : index
    %242 = vector.load %arg1[%c5_161, %c0_162, %c0_163] : memref<20x20x16xf32, #tpu.memory_space<vmem>>, vector<1x20x16xf32>
    %243 = vector.shape_cast %242 : vector<1x20x16xf32> to vector<20x16xf32>
    %244 = arith.maximumf %241, %243 : vector<20x16xf32>
    %c6_164 = arith.constant 6 : index
    %c0_165 = arith.constant 0 : index
    %c0_166 = arith.constant 0 : index
    %245 = vector.load %arg1[%c6_164, %c0_165, %c0_166] : memref<20x20x16xf32, #tpu.memory_space<vmem>>, vector<1x20x16xf32>
    %246 = vector.shape_cast %245 : vector<1x20x16xf32> to vector<20x16xf32>
    %247 = arith.maximumf %244, %246 : vector<20x16xf32>
    %c7_167 = arith.constant 7 : index
    %c0_168 = arith.constant 0 : index
    %c0_169 = arith.constant 0 : index
    %248 = vector.load %arg1[%c7_167, %c0_168, %c0_169] : memref<20x20x16xf32, #tpu.memory_space<vmem>>, vector<1x20x16xf32>
    %249 = vector.shape_cast %248 : vector<1x20x16xf32> to vector<20x16xf32>
    %250 = arith.maximumf %247, %249 : vector<20x16xf32>
    %c1_i32_170 = arith.constant 1 : i32
    %251 = tpu.dynamic_rotate %250 by %c1_i32_170 dim 0 : vector<20x16xf32>, i32 -> vector<20x16xf32>
    %252 = arith.maximumf %250, %251 : vector<20x16xf32>
    %c2_i32_171 = arith.constant 2 : i32
    %253 = tpu.dynamic_rotate %252 by %c2_i32_171 dim 0 : vector<20x16xf32>, i32 -> vector<20x16xf32>
    %254 = arith.maximumf %252, %253 : vector<20x16xf32>
    %c4_i32_172 = arith.constant 4 : i32
    %255 = tpu.dynamic_rotate %254 by %c4_i32_172 dim 0 : vector<20x16xf32>, i32 -> vector<20x16xf32>
    %256 = arith.maximumf %254, %255 : vector<20x16xf32>
    %257 = arith.addf %227, %256 : vector<20x16xf32>
    %c8_173 = arith.constant 8 : index
    %c0_174 = arith.constant 0 : index
    %c0_175 = arith.constant 0 : index
    %258 = vector.load %arg1[%c8_173, %c0_174, %c0_175] : memref<20x20x16xf32, #tpu.memory_space<vmem>>, vector<1x20x16xf32>
    %259 = vector.shape_cast %258 : vector<1x20x16xf32> to vector<20x16xf32>
    %c9_176 = arith.constant 9 : index
    %c0_177 = arith.constant 0 : index
    %c0_178 = arith.constant 0 : index
    %260 = vector.load %arg1[%c9_176, %c0_177, %c0_178] : memref<20x20x16xf32, #tpu.memory_space<vmem>>, vector<1x20x16xf32>
    %261 = vector.shape_cast %260 : vector<1x20x16xf32> to vector<20x16xf32>
    %262 = arith.maximumf %259, %261 : vector<20x16xf32>
    %c10_179 = arith.constant 10 : index
    %c0_180 = arith.constant 0 : index
    %c0_181 = arith.constant 0 : index
    %263 = vector.load %arg1[%c10_179, %c0_180, %c0_181] : memref<20x20x16xf32, #tpu.memory_space<vmem>>, vector<1x20x16xf32>
    %264 = vector.shape_cast %263 : vector<1x20x16xf32> to vector<20x16xf32>
    %265 = arith.maximumf %262, %264 : vector<20x16xf32>
    %c11_182 = arith.constant 11 : index
    %c0_183 = arith.constant 0 : index
    %c0_184 = arith.constant 0 : index
    %266 = vector.load %arg1[%c11_182, %c0_183, %c0_184] : memref<20x20x16xf32, #tpu.memory_space<vmem>>, vector<1x20x16xf32>
    %267 = vector.shape_cast %266 : vector<1x20x16xf32> to vector<20x16xf32>
    %268 = arith.maximumf %265, %267 : vector<20x16xf32>
    %c12_185 = arith.constant 12 : index
    %c0_186 = arith.constant 0 : index
    %c0_187 = arith.constant 0 : index
    %269 = vector.load %arg1[%c12_185, %c0_186, %c0_187] : memref<20x20x16xf32, #tpu.memory_space<vmem>>, vector<1x20x16xf32>
    %270 = vector.shape_cast %269 : vector<1x20x16xf32> to vector<20x16xf32>
    %271 = arith.maximumf %268, %270 : vector<20x16xf32>
    %c13_188 = arith.constant 13 : index
    %c0_189 = arith.constant 0 : index
    %c0_190 = arith.constant 0 : index
    %272 = vector.load %arg1[%c13_188, %c0_189, %c0_190] : memref<20x20x16xf32, #tpu.memory_space<vmem>>, vector<1x20x16xf32>
    %273 = vector.shape_cast %272 : vector<1x20x16xf32> to vector<20x16xf32>
    %274 = arith.maximumf %271, %273 : vector<20x16xf32>
    %c14_191 = arith.constant 14 : index
    %c0_192 = arith.constant 0 : index
    %c0_193 = arith.constant 0 : index
    %275 = vector.load %arg1[%c14_191, %c0_192, %c0_193] : memref<20x20x16xf32, #tpu.memory_space<vmem>>, vector<1x20x16xf32>
    %276 = vector.shape_cast %275 : vector<1x20x16xf32> to vector<20x16xf32>
    %277 = arith.maximumf %274, %276 : vector<20x16xf32>
    %c15_194 = arith.constant 15 : index
    %c0_195 = arith.constant 0 : index
    %c0_196 = arith.constant 0 : index
    %278 = vector.load %arg1[%c15_194, %c0_195, %c0_196] : memref<20x20x16xf32, #tpu.memory_space<vmem>>, vector<1x20x16xf32>
    %279 = vector.shape_cast %278 : vector<1x20x16xf32> to vector<20x16xf32>
    %280 = arith.maximumf %277, %279 : vector<20x16xf32>
    %c1_i32_197 = arith.constant 1 : i32
    %281 = tpu.dynamic_rotate %280 by %c1_i32_197 dim 0 : vector<20x16xf32>, i32 -> vector<20x16xf32>
    %282 = arith.maximumf %280, %281 : vector<20x16xf32>
    %c2_i32_198 = arith.constant 2 : i32
    %283 = tpu.dynamic_rotate %282 by %c2_i32_198 dim 0 : vector<20x16xf32>, i32 -> vector<20x16xf32>
    %284 = arith.maximumf %282, %283 : vector<20x16xf32>
    %c4_i32_199 = arith.constant 4 : i32
    %285 = tpu.dynamic_rotate %284 by %c4_i32_199 dim 0 : vector<20x16xf32>, i32 -> vector<20x16xf32>
    %286 = arith.maximumf %284, %285 : vector<20x16xf32>
    %287 = arith.addf %257, %286 : vector<20x16xf32>
    %c7_i32 = arith.constant 7 : i32
    %288 = vector.broadcast %c7_i32 : i32 to vector<20x16xi32>
    %289 = arith.subi %0, %288 : vector<20x16xi32>
    %c0_i32_200 = arith.constant 0 : i32
    %290 = vector.broadcast %c0_i32_200 : i32 to vector<20x16xi32>
    %291 = arith.cmpi sge, %289, %290 : vector<20x16xi32>
    %c8_i32 = arith.constant 8 : i32
    %c0_i32_201 = arith.constant 0 : i32
    %292 = arith.cmpi eq, %c8_i32, %c0_i32_201 : i32
    %c1_i32_202 = arith.constant 1 : i32
    %293 = arith.select %292, %c1_i32_202, %c8_i32 : i32
    %294 = vector.broadcast %293 : i32 to vector<20x16xi32>
    %295 = arith.remsi %289, %294 : vector<20x16xi32>
    %c0_i32_203 = arith.constant 0 : i32
    %296 = vector.broadcast %c0_i32_203 : i32 to vector<20x16xi32>
    %297 = arith.cmpi ne, %295, %296 : vector<20x16xi32>
    %c0_i32_204 = arith.constant 0 : i32
    %298 = vector.broadcast %c0_i32_204 : i32 to vector<20x16xi32>
    %299 = arith.cmpi slt, %295, %298 : vector<20x16xi32>
    %c0_i32_205 = arith.constant 0 : i32
    %300 = arith.cmpi slt, %293, %c0_i32_205 : i32
    %301 = vector.broadcast %300 : i1 to vector<20x16xi1>
    %302 = vector.broadcast %301 : vector<20x16xi1> to vector<20x16xi1>
    %303 = arith.xori %299, %302 : vector<20x16xi1>
    %304 = arith.andi %303, %297 : vector<20x16xi1>
    %305 = vector.broadcast %293 : i32 to vector<20x16xi32>
    %306 = arith.addi %295, %305 : vector<20x16xi32>
    %307 = arith.select %304, %306, %295 : vector<20x16xi1>, vector<20x16xi32>
    %c0_i32_206 = arith.constant 0 : i32
    %308 = vector.broadcast %c0_i32_206 : i32 to vector<20x16xi32>
    %309 = arith.cmpi eq, %307, %308 : vector<20x16xi32>
    %310 = arith.andi %291, %309 : vector<20x16xi1>
    %cst_207 = arith.constant 0.000000e+00 : f32
    %311 = vector.broadcast %cst_207 : f32 to vector<20x16xf32>
    %312 = arith.select %310, %287, %311 : vector<20x16xi1>, vector<20x16xf32>
    %cst_208 = arith.constant dense<0.000000e+00> : vector<16xf32>
    %313 = vector.multi_reduction <add>, %312, %cst_208 [0] : vector<20x16xf32> to vector<16xf32>
    %314 = vector.shape_cast %313 : vector<16xf32> to vector<1x16xf32>
    %c2_209 = arith.constant 2 : index
    %c0_210 = arith.constant 0 : index
    %c0_211 = arith.constant 0 : index
    %315 = vector.load %arg2[%c2_209, %c0_210, %c0_211] : memref<5x1x16xf32, #tpu.memory_space<vmem>>, vector<1x1x16xf32>
    %316 = vector.shape_cast %315 : vector<1x1x16xf32> to vector<1x16xf32>
    %317 = vector.shape_cast %314 : vector<1x16xf32> to vector<1x1x16xf32>
    tpu.vector_store %arg2[%c2_209, %c0_210, %c0_211], %317 {strides = array<i32>} : memref<5x1x16xf32, #tpu.memory_space<vmem>>, vector<1x1x16xf32>,
    %cst_212 = arith.constant 0.000000e+00 : f32
    %318 = vector.broadcast %cst_212 : f32 to vector<20x16xf32>
    %c0_213 = arith.constant 0 : index
    %c0_214 = arith.constant 0 : index
    %c0_215 = arith.constant 0 : index
    %319 = vector.load %arg1[%c0_213, %c0_214, %c0_215] : memref<20x20x16xf32, #tpu.memory_space<vmem>>, vector<1x20x16xf32>
    %320 = vector.shape_cast %319 : vector<1x20x16xf32> to vector<20x16xf32>
    %c1_216 = arith.constant 1 : index
    %c0_217 = arith.constant 0 : index
    %c0_218 = arith.constant 0 : index
    %321 = vector.load %arg1[%c1_216, %c0_217, %c0_218] : memref<20x20x16xf32, #tpu.memory_space<vmem>>, vector<1x20x16xf32>
    %322 = vector.shape_cast %321 : vector<1x20x16xf32> to vector<20x16xf32>
    %323 = arith.maximumf %320, %322 : vector<20x16xf32>
    %c2_219 = arith.constant 2 : index
    %c0_220 = arith.constant 0 : index
    %c0_221 = arith.constant 0 : index
    %324 = vector.load %arg1[%c2_219, %c0_220, %c0_221] : memref<20x20x16xf32, #tpu.memory_space<vmem>>, vector<1x20x16xf32>
    %325 = vector.shape_cast %324 : vector<1x20x16xf32> to vector<20x16xf32>
    %326 = arith.maximumf %323, %325 : vector<20x16xf32>
    %c3_222 = arith.constant 3 : index
    %c0_223 = arith.constant 0 : index
    %c0_224 = arith.constant 0 : index
    %327 = vector.load %arg1[%c3_222, %c0_223, %c0_224] : memref<20x20x16xf32, #tpu.memory_space<vmem>>, vector<1x20x16xf32>
    %328 = vector.shape_cast %327 : vector<1x20x16xf32> to vector<20x16xf32>
    %329 = arith.maximumf %326, %328 : vector<20x16xf32>
    %c4_225 = arith.constant 4 : index
    %c0_226 = arith.constant 0 : index
    %c0_227 = arith.constant 0 : index
    %330 = vector.load %arg1[%c4_225, %c0_226, %c0_227] : memref<20x20x16xf32, #tpu.memory_space<vmem>>, vector<1x20x16xf32>
    %331 = vector.shape_cast %330 : vector<1x20x16xf32> to vector<20x16xf32>
    %332 = arith.maximumf %329, %331 : vector<20x16xf32>
    %c5_228 = arith.constant 5 : index
    %c0_229 = arith.constant 0 : index
    %c0_230 = arith.constant 0 : index
    %333 = vector.load %arg1[%c5_228, %c0_229, %c0_230] : memref<20x20x16xf32, #tpu.memory_space<vmem>>, vector<1x20x16xf32>
    %334 = vector.shape_cast %333 : vector<1x20x16xf32> to vector<20x16xf32>
    %335 = arith.maximumf %332, %334 : vector<20x16xf32>
    %c6_231 = arith.constant 6 : index
    %c0_232 = arith.constant 0 : index
    %c0_233 = arith.constant 0 : index
    %336 = vector.load %arg1[%c6_231, %c0_232, %c0_233] : memref<20x20x16xf32, #tpu.memory_space<vmem>>, vector<1x20x16xf32>
    %337 = vector.shape_cast %336 : vector<1x20x16xf32> to vector<20x16xf32>
    %338 = arith.maximumf %335, %337 : vector<20x16xf32>
    %c7_234 = arith.constant 7 : index
    %c0_235 = arith.constant 0 : index
    %c0_236 = arith.constant 0 : index
    %339 = vector.load %arg1[%c7_234, %c0_235, %c0_236] : memref<20x20x16xf32, #tpu.memory_space<vmem>>, vector<1x20x16xf32>
    %340 = vector.shape_cast %339 : vector<1x20x16xf32> to vector<20x16xf32>
    %341 = arith.maximumf %338, %340 : vector<20x16xf32>
    %c8_237 = arith.constant 8 : index
    %c0_238 = arith.constant 0 : index
    %c0_239 = arith.constant 0 : index
    %342 = vector.load %arg1[%c8_237, %c0_238, %c0_239] : memref<20x20x16xf32, #tpu.memory_space<vmem>>, vector<1x20x16xf32>
    %343 = vector.shape_cast %342 : vector<1x20x16xf32> to vector<20x16xf32>
    %344 = arith.maximumf %341, %343 : vector<20x16xf32>
    %c9_240 = arith.constant 9 : index
    %c0_241 = arith.constant 0 : index
    %c0_242 = arith.constant 0 : index
    %345 = vector.load %arg1[%c9_240, %c0_241, %c0_242] : memref<20x20x16xf32, #tpu.memory_space<vmem>>, vector<1x20x16xf32>
    %346 = vector.shape_cast %345 : vector<1x20x16xf32> to vector<20x16xf32>
    %347 = arith.maximumf %344, %346 : vector<20x16xf32>
    %c1_i32_243 = arith.constant 1 : i32
    %348 = tpu.dynamic_rotate %347 by %c1_i32_243 dim 0 : vector<20x16xf32>, i32 -> vector<20x16xf32>
    %349 = arith.maximumf %347, %348 : vector<20x16xf32>
    %c2_i32_244 = arith.constant 2 : i32
    %350 = tpu.dynamic_rotate %349 by %c2_i32_244 dim 0 : vector<20x16xf32>, i32 -> vector<20x16xf32>
    %351 = arith.maximumf %349, %350 : vector<20x16xf32>
    %c4_i32_245 = arith.constant 4 : i32
    %352 = tpu.dynamic_rotate %351 by %c4_i32_245 dim 0 : vector<20x16xf32>, i32 -> vector<20x16xf32>
    %353 = arith.maximumf %351, %352 : vector<20x16xf32>
    %c2_i32_246 = arith.constant 2 : i32
    %354 = tpu.dynamic_rotate %353 by %c2_i32_246 dim 0 : vector<20x16xf32>, i32 -> vector<20x16xf32>
    %355 = arith.maximumf %353, %354 : vector<20x16xf32>
    %356 = arith.addf %318, %355 : vector<20x16xf32>
    %c10_247 = arith.constant 10 : index
    %c0_248 = arith.constant 0 : index
    %c0_249 = arith.constant 0 : index
    %357 = vector.load %arg1[%c10_247, %c0_248, %c0_249] : memref<20x20x16xf32, #tpu.memory_space<vmem>>, vector<1x20x16xf32>
    %358 = vector.shape_cast %357 : vector<1x20x16xf32> to vector<20x16xf32>
    %c11_250 = arith.constant 11 : index
    %c0_251 = arith.constant 0 : index
    %c0_252 = arith.constant 0 : index
    %359 = vector.load %arg1[%c11_250, %c0_251, %c0_252] : memref<20x20x16xf32, #tpu.memory_space<vmem>>, vector<1x20x16xf32>
    %360 = vector.shape_cast %359 : vector<1x20x16xf32> to vector<20x16xf32>
    %361 = arith.maximumf %358, %360 : vector<20x16xf32>
    %c12_253 = arith.constant 12 : index
    %c0_254 = arith.constant 0 : index
    %c0_255 = arith.constant 0 : index
    %362 = vector.load %arg1[%c12_253, %c0_254, %c0_255] : memref<20x20x16xf32, #tpu.memory_space<vmem>>, vector<1x20x16xf32>
    %363 = vector.shape_cast %362 : vector<1x20x16xf32> to vector<20x16xf32>
    %364 = arith.maximumf %361, %363 : vector<20x16xf32>
    %c13_256 = arith.constant 13 : index
    %c0_257 = arith.constant 0 : index
    %c0_258 = arith.constant 0 : index
    %365 = vector.load %arg1[%c13_256, %c0_257, %c0_258] : memref<20x20x16xf32, #tpu.memory_space<vmem>>, vector<1x20x16xf32>
    %366 = vector.shape_cast %365 : vector<1x20x16xf32> to vector<20x16xf32>
    %367 = arith.maximumf %364, %366 : vector<20x16xf32>
    %c14_259 = arith.constant 14 : index
    %c0_260 = arith.constant 0 : index
    %c0_261 = arith.constant 0 : index
    %368 = vector.load %arg1[%c14_259, %c0_260, %c0_261] : memref<20x20x16xf32, #tpu.memory_space<vmem>>, vector<1x20x16xf32>
    %369 = vector.shape_cast %368 : vector<1x20x16xf32> to vector<20x16xf32>
    %370 = arith.maximumf %367, %369 : vector<20x16xf32>
    %c15_262 = arith.constant 15 : index
    %c0_263 = arith.constant 0 : index
    %c0_264 = arith.constant 0 : index
    %371 = vector.load %arg1[%c15_262, %c0_263, %c0_264] : memref<20x20x16xf32, #tpu.memory_space<vmem>>, vector<1x20x16xf32>
    %372 = vector.shape_cast %371 : vector<1x20x16xf32> to vector<20x16xf32>
    %373 = arith.maximumf %370, %372 : vector<20x16xf32>
    %c16_265 = arith.constant 16 : index
    %c0_266 = arith.constant 0 : index
    %c0_267 = arith.constant 0 : index
    %374 = vector.load %arg1[%c16_265, %c0_266, %c0_267] : memref<20x20x16xf32, #tpu.memory_space<vmem>>, vector<1x20x16xf32>
    %375 = vector.shape_cast %374 : vector<1x20x16xf32> to vector<20x16xf32>
    %376 = arith.maximumf %373, %375 : vector<20x16xf32>
    %c17_268 = arith.constant 17 : index
    %c0_269 = arith.constant 0 : index
    %c0_270 = arith.constant 0 : index
    %377 = vector.load %arg1[%c17_268, %c0_269, %c0_270] : memref<20x20x16xf32, #tpu.memory_space<vmem>>, vector<1x20x16xf32>
    %378 = vector.shape_cast %377 : vector<1x20x16xf32> to vector<20x16xf32>
    %379 = arith.maximumf %376, %378 : vector<20x16xf32>
    %c18_271 = arith.constant 18 : index
    %c0_272 = arith.constant 0 : index
    %c0_273 = arith.constant 0 : index
    %380 = vector.load %arg1[%c18_271, %c0_272, %c0_273] : memref<20x20x16xf32, #tpu.memory_space<vmem>>, vector<1x20x16xf32>
    %381 = vector.shape_cast %380 : vector<1x20x16xf32> to vector<20x16xf32>
    %382 = arith.maximumf %379, %381 : vector<20x16xf32>
    %c19_274 = arith.constant 19 : index
    %c0_275 = arith.constant 0 : index
    %c0_276 = arith.constant 0 : index
    %383 = vector.load %arg1[%c19_274, %c0_275, %c0_276] : memref<20x20x16xf32, #tpu.memory_space<vmem>>, vector<1x20x16xf32>
    %384 = vector.shape_cast %383 : vector<1x20x16xf32> to vector<20x16xf32>
    %385 = arith.maximumf %382, %384 : vector<20x16xf32>
    %c1_i32_277 = arith.constant 1 : i32
    %386 = tpu.dynamic_rotate %385 by %c1_i32_277 dim 0 : vector<20x16xf32>, i32 -> vector<20x16xf32>
    %387 = arith.maximumf %385, %386 : vector<20x16xf32>
    %c2_i32_278 = arith.constant 2 : i32
    %388 = tpu.dynamic_rotate %387 by %c2_i32_278 dim 0 : vector<20x16xf32>, i32 -> vector<20x16xf32>
    %389 = arith.maximumf %387, %388 : vector<20x16xf32>
    %c4_i32_279 = arith.constant 4 : i32
    %390 = tpu.dynamic_rotate %389 by %c4_i32_279 dim 0 : vector<20x16xf32>, i32 -> vector<20x16xf32>
    %391 = arith.maximumf %389, %390 : vector<20x16xf32>
    %c2_i32_280 = arith.constant 2 : i32
    %392 = tpu.dynamic_rotate %391 by %c2_i32_280 dim 0 : vector<20x16xf32>, i32 -> vector<20x16xf32>
    %393 = arith.maximumf %391, %392 : vector<20x16xf32>
    %394 = arith.addf %356, %393 : vector<20x16xf32>
    %c9_i32 = arith.constant 9 : i32
    %395 = vector.broadcast %c9_i32 : i32 to vector<20x16xi32>
    %396 = arith.subi %0, %395 : vector<20x16xi32>
    %c0_i32_281 = arith.constant 0 : i32
    %397 = vector.broadcast %c0_i32_281 : i32 to vector<20x16xi32>
    %398 = arith.cmpi sge, %396, %397 : vector<20x16xi32>
    %c10_i32 = arith.constant 10 : i32
    %c0_i32_282 = arith.constant 0 : i32
    %399 = arith.cmpi eq, %c10_i32, %c0_i32_282 : i32
    %c1_i32_283 = arith.constant 1 : i32
    %400 = arith.select %399, %c1_i32_283, %c10_i32 : i32
    %401 = vector.broadcast %400 : i32 to vector<20x16xi32>
    %402 = arith.remsi %396, %401 : vector<20x16xi32>
    %c0_i32_284 = arith.constant 0 : i32
    %403 = vector.broadcast %c0_i32_284 : i32 to vector<20x16xi32>
    %404 = arith.cmpi ne, %402, %403 : vector<20x16xi32>
    %c0_i32_285 = arith.constant 0 : i32
    %405 = vector.broadcast %c0_i32_285 : i32 to vector<20x16xi32>
    %406 = arith.cmpi slt, %402, %405 : vector<20x16xi32>
    %c0_i32_286 = arith.constant 0 : i32
    %407 = arith.cmpi slt, %400, %c0_i32_286 : i32
    %408 = vector.broadcast %407 : i1 to vector<20x16xi1>
    %409 = vector.broadcast %408 : vector<20x16xi1> to vector<20x16xi1>
    %410 = arith.xori %406, %409 : vector<20x16xi1>
    %411 = arith.andi %410, %404 : vector<20x16xi1>
    %412 = vector.broadcast %400 : i32 to vector<20x16xi32>
    %413 = arith.addi %402, %412 : vector<20x16xi32>
    %414 = arith.select %411, %413, %402 : vector<20x16xi1>, vector<20x16xi32>
    %c0_i32_287 = arith.constant 0 : i32
    %415 = vector.broadcast %c0_i32_287 : i32 to vector<20x16xi32>
    %416 = arith.cmpi eq, %414, %415 : vector<20x16xi32>
    %417 = arith.andi %398, %416 : vector<20x16xi1>
    %cst_288 = arith.constant 0.000000e+00 : f32
    %418 = vector.broadcast %cst_288 : f32 to vector<20x16xf32>
    %419 = arith.select %417, %394, %418 : vector<20x16xi1>, vector<20x16xf32>
    %cst_289 = arith.constant dense<0.000000e+00> : vector<16xf32>
    %420 = vector.multi_reduction <add>, %419, %cst_289 [0] : vector<20x16xf32> to vector<16xf32>
    %421 = vector.shape_cast %420 : vector<16xf32> to vector<1x16xf32>
    %c3_290 = arith.constant 3 : index
    %c0_291 = arith.constant 0 : index
    %c0_292 = arith.constant 0 : index
    %422 = vector.load %arg2[%c3_290, %c0_291, %c0_292] : memref<5x1x16xf32, #tpu.memory_space<vmem>>, vector<1x1x16xf32>
    %423 = vector.shape_cast %422 : vector<1x1x16xf32> to vector<1x16xf32>
    %424 = vector.shape_cast %421 : vector<1x16xf32> to vector<1x1x16xf32>
    tpu.vector_store %arg2[%c3_290, %c0_291, %c0_292], %424 {strides = array<i32>} : memref<5x1x16xf32, #tpu.memory_space<vmem>>, vector<1x1x16xf32>,
    %cst_293 = arith.constant 0.000000e+00 : f32
    %425 = vector.broadcast %cst_293 : f32 to vector<20x16xf32>
    %c0_294 = arith.constant 0 : index
    %c0_295 = arith.constant 0 : index
    %c0_296 = arith.constant 0 : index
    %426 = vector.load %arg1[%c0_294, %c0_295, %c0_296] : memref<20x20x16xf32, #tpu.memory_space<vmem>>, vector<1x20x16xf32>
    %427 = vector.shape_cast %426 : vector<1x20x16xf32> to vector<20x16xf32>
    %c1_297 = arith.constant 1 : index
    %c0_298 = arith.constant 0 : index
    %c0_299 = arith.constant 0 : index
    %428 = vector.load %arg1[%c1_297, %c0_298, %c0_299] : memref<20x20x16xf32, #tpu.memory_space<vmem>>, vector<1x20x16xf32>
    %429 = vector.shape_cast %428 : vector<1x20x16xf32> to vector<20x16xf32>
    %430 = arith.maximumf %427, %429 : vector<20x16xf32>
    %c2_300 = arith.constant 2 : index
    %c0_301 = arith.constant 0 : index
    %c0_302 = arith.constant 0 : index
    %431 = vector.load %arg1[%c2_300, %c0_301, %c0_302] : memref<20x20x16xf32, #tpu.memory_space<vmem>>, vector<1x20x16xf32>
    %432 = vector.shape_cast %431 : vector<1x20x16xf32> to vector<20x16xf32>
    %433 = arith.maximumf %430, %432 : vector<20x16xf32>
    %c3_303 = arith.constant 3 : index
    %c0_304 = arith.constant 0 : index
    %c0_305 = arith.constant 0 : index
    %434 = vector.load %arg1[%c3_303, %c0_304, %c0_305] : memref<20x20x16xf32, #tpu.memory_space<vmem>>, vector<1x20x16xf32>
    %435 = vector.shape_cast %434 : vector<1x20x16xf32> to vector<20x16xf32>
    %436 = arith.maximumf %433, %435 : vector<20x16xf32>
    %c4_306 = arith.constant 4 : index
    %c0_307 = arith.constant 0 : index
    %c0_308 = arith.constant 0 : index
    %437 = vector.load %arg1[%c4_306, %c0_307, %c0_308] : memref<20x20x16xf32, #tpu.memory_space<vmem>>, vector<1x20x16xf32>
    %438 = vector.shape_cast %437 : vector<1x20x16xf32> to vector<20x16xf32>
    %439 = arith.maximumf %436, %438 : vector<20x16xf32>
    %c5_309 = arith.constant 5 : index
    %c0_310 = arith.constant 0 : index
    %c0_311 = arith.constant 0 : index
    %440 = vector.load %arg1[%c5_309, %c0_310, %c0_311] : memref<20x20x16xf32, #tpu.memory_space<vmem>>, vector<1x20x16xf32>
    %441 = vector.shape_cast %440 : vector<1x20x16xf32> to vector<20x16xf32>
    %442 = arith.maximumf %439, %441 : vector<20x16xf32>
    %c6_312 = arith.constant 6 : index
    %c0_313 = arith.constant 0 : index
    %c0_314 = arith.constant 0 : index
    %443 = vector.load %arg1[%c6_312, %c0_313, %c0_314] : memref<20x20x16xf32, #tpu.memory_space<vmem>>, vector<1x20x16xf32>
    %444 = vector.shape_cast %443 : vector<1x20x16xf32> to vector<20x16xf32>
    %445 = arith.maximumf %442, %444 : vector<20x16xf32>
    %c7_315 = arith.constant 7 : index
    %c0_316 = arith.constant 0 : index
    %c0_317 = arith.constant 0 : index
    %446 = vector.load %arg1[%c7_315, %c0_316, %c0_317] : memref<20x20x16xf32, #tpu.memory_space<vmem>>, vector<1x20x16xf32>
    %447 = vector.shape_cast %446 : vector<1x20x16xf32> to vector<20x16xf32>
    %448 = arith.maximumf %445, %447 : vector<20x16xf32>
    %c8_318 = arith.constant 8 : index
    %c0_319 = arith.constant 0 : index
    %c0_320 = arith.constant 0 : index
    %449 = vector.load %arg1[%c8_318, %c0_319, %c0_320] : memref<20x20x16xf32, #tpu.memory_space<vmem>>, vector<1x20x16xf32>
    %450 = vector.shape_cast %449 : vector<1x20x16xf32> to vector<20x16xf32>
    %451 = arith.maximumf %448, %450 : vector<20x16xf32>
    %c9_321 = arith.constant 9 : index
    %c0_322 = arith.constant 0 : index
    %c0_323 = arith.constant 0 : index
    %452 = vector.load %arg1[%c9_321, %c0_322, %c0_323] : memref<20x20x16xf32, #tpu.memory_space<vmem>>, vector<1x20x16xf32>
    %453 = vector.shape_cast %452 : vector<1x20x16xf32> to vector<20x16xf32>
    %454 = arith.maximumf %451, %453 : vector<20x16xf32>
    %c10_324 = arith.constant 10 : index
    %c0_325 = arith.constant 0 : index
    %c0_326 = arith.constant 0 : index
    %455 = vector.load %arg1[%c10_324, %c0_325, %c0_326] : memref<20x20x16xf32, #tpu.memory_space<vmem>>, vector<1x20x16xf32>
    %456 = vector.shape_cast %455 : vector<1x20x16xf32> to vector<20x16xf32>
    %457 = arith.maximumf %454, %456 : vector<20x16xf32>
    %c11_327 = arith.constant 11 : index
    %c0_328 = arith.constant 0 : index
    %c0_329 = arith.constant 0 : index
    %458 = vector.load %arg1[%c11_327, %c0_328, %c0_329] : memref<20x20x16xf32, #tpu.memory_space<vmem>>, vector<1x20x16xf32>
    %459 = vector.shape_cast %458 : vector<1x20x16xf32> to vector<20x16xf32>
    %460 = arith.maximumf %457, %459 : vector<20x16xf32>
    %c12_330 = arith.constant 12 : index
    %c0_331 = arith.constant 0 : index
    %c0_332 = arith.constant 0 : index
    %461 = vector.load %arg1[%c12_330, %c0_331, %c0_332] : memref<20x20x16xf32, #tpu.memory_space<vmem>>, vector<1x20x16xf32>
    %462 = vector.shape_cast %461 : vector<1x20x16xf32> to vector<20x16xf32>
    %463 = arith.maximumf %460, %462 : vector<20x16xf32>
    %c13_333 = arith.constant 13 : index
    %c0_334 = arith.constant 0 : index
    %c0_335 = arith.constant 0 : index
    %464 = vector.load %arg1[%c13_333, %c0_334, %c0_335] : memref<20x20x16xf32, #tpu.memory_space<vmem>>, vector<1x20x16xf32>
    %465 = vector.shape_cast %464 : vector<1x20x16xf32> to vector<20x16xf32>
    %466 = arith.maximumf %463, %465 : vector<20x16xf32>
    %c14_336 = arith.constant 14 : index
    %c0_337 = arith.constant 0 : index
    %c0_338 = arith.constant 0 : index
    %467 = vector.load %arg1[%c14_336, %c0_337, %c0_338] : memref<20x20x16xf32, #tpu.memory_space<vmem>>, vector<1x20x16xf32>
    %468 = vector.shape_cast %467 : vector<1x20x16xf32> to vector<20x16xf32>
    %469 = arith.maximumf %466, %468 : vector<20x16xf32>
    %c15_339 = arith.constant 15 : index
    %c0_340 = arith.constant 0 : index
    %c0_341 = arith.constant 0 : index
    %470 = vector.load %arg1[%c15_339, %c0_340, %c0_341] : memref<20x20x16xf32, #tpu.memory_space<vmem>>, vector<1x20x16xf32>
    %471 = vector.shape_cast %470 : vector<1x20x16xf32> to vector<20x16xf32>
    %472 = arith.maximumf %469, %471 : vector<20x16xf32>
    %c16_342 = arith.constant 16 : index
    %c0_343 = arith.constant 0 : index
    %c0_344 = arith.constant 0 : index
    %473 = vector.load %arg1[%c16_342, %c0_343, %c0_344] : memref<20x20x16xf32, #tpu.memory_space<vmem>>, vector<1x20x16xf32>
    %474 = vector.shape_cast %473 : vector<1x20x16xf32> to vector<20x16xf32>
    %475 = arith.maximumf %472, %474 : vector<20x16xf32>
    %c17_345 = arith.constant 17 : index
    %c0_346 = arith.constant 0 : index
    %c0_347 = arith.constant 0 : index
    %476 = vector.load %arg1[%c17_345, %c0_346, %c0_347] : memref<20x20x16xf32, #tpu.memory_space<vmem>>, vector<1x20x16xf32>
    %477 = vector.shape_cast %476 : vector<1x20x16xf32> to vector<20x16xf32>
    %478 = arith.maximumf %475, %477 : vector<20x16xf32>
    %c18_348 = arith.constant 18 : index
    %c0_349 = arith.constant 0 : index
    %c0_350 = arith.constant 0 : index
    %479 = vector.load %arg1[%c18_348, %c0_349, %c0_350] : memref<20x20x16xf32, #tpu.memory_space<vmem>>, vector<1x20x16xf32>
    %480 = vector.shape_cast %479 : vector<1x20x16xf32> to vector<20x16xf32>
    %481 = arith.maximumf %478, %480 : vector<20x16xf32>
    %c19_351 = arith.constant 19 : index
    %c0_352 = arith.constant 0 : index
    %c0_353 = arith.constant 0 : index
    %482 = vector.load %arg1[%c19_351, %c0_352, %c0_353] : memref<20x20x16xf32, #tpu.memory_space<vmem>>, vector<1x20x16xf32>
    %483 = vector.shape_cast %482 : vector<1x20x16xf32> to vector<20x16xf32>
    %484 = arith.maximumf %481, %483 : vector<20x16xf32>
    %c1_i32_354 = arith.constant 1 : i32
    %485 = tpu.dynamic_rotate %484 by %c1_i32_354 dim 0 : vector<20x16xf32>, i32 -> vector<20x16xf32>
    %486 = arith.maximumf %484, %485 : vector<20x16xf32>
    %c2_i32_355 = arith.constant 2 : i32
    %487 = tpu.dynamic_rotate %486 by %c2_i32_355 dim 0 : vector<20x16xf32>, i32 -> vector<20x16xf32>
    %488 = arith.maximumf %486, %487 : vector<20x16xf32>
    %c4_i32_356 = arith.constant 4 : i32
    %489 = tpu.dynamic_rotate %488 by %c4_i32_356 dim 0 : vector<20x16xf32>, i32 -> vector<20x16xf32>
    %490 = arith.maximumf %488, %489 : vector<20x16xf32>
    %c8_i32_357 = arith.constant 8 : i32
    %491 = tpu.dynamic_rotate %490 by %c8_i32_357 dim 0 : vector<20x16xf32>, i32 -> vector<20x16xf32>
    %492 = arith.maximumf %490, %491 : vector<20x16xf32>
    %c4_i32_358 = arith.constant 4 : i32
    %493 = tpu.dynamic_rotate %492 by %c4_i32_358 dim 0 : vector<20x16xf32>, i32 -> vector<20x16xf32>
    %494 = arith.maximumf %492, %493 : vector<20x16xf32>
    %495 = arith.addf %425, %494 : vector<20x16xf32>
    %c19_i32 = arith.constant 19 : i32
    %496 = vector.broadcast %c19_i32 : i32 to vector<20x16xi32>
    %497 = arith.subi %0, %496 : vector<20x16xi32>
    %c0_i32_359 = arith.constant 0 : i32
    %498 = vector.broadcast %c0_i32_359 : i32 to vector<20x16xi32>
    %499 = arith.cmpi sge, %497, %498 : vector<20x16xi32>
    %c20_i32 = arith.constant 20 : i32
    %c0_i32_360 = arith.constant 0 : i32
    %500 = arith.cmpi eq, %c20_i32, %c0_i32_360 : i32
    %c1_i32_361 = arith.constant 1 : i32
    %501 = arith.select %500, %c1_i32_361, %c20_i32 : i32
    %502 = vector.broadcast %501 : i32 to vector<20x16xi32>
    %503 = arith.remsi %497, %502 : vector<20x16xi32>
    %c0_i32_362 = arith.constant 0 : i32
    %504 = vector.broadcast %c0_i32_362 : i32 to vector<20x16xi32>
    %505 = arith.cmpi ne, %503, %504 : vector<20x16xi32>
    %c0_i32_363 = arith.constant 0 : i32
    %506 = vector.broadcast %c0_i32_363 : i32 to vector<20x16xi32>
    %507 = arith.cmpi slt, %503, %506 : vector<20x16xi32>
    %c0_i32_364 = arith.constant 0 : i32
    %508 = arith.cmpi slt, %501, %c0_i32_364 : i32
    %509 = vector.broadcast %508 : i1 to vector<20x16xi1>
    %510 = vector.broadcast %509 : vector<20x16xi1> to vector<20x16xi1>
    %511 = arith.xori %507, %510 : vector<20x16xi1>
    %512 = arith.andi %511, %505 : vector<20x16xi1>
    %513 = vector.broadcast %501 : i32 to vector<20x16xi32>
    %514 = arith.addi %503, %513 : vector<20x16xi32>
    %515 = arith.select %512, %514, %503 : vector<20x16xi1>, vector<20x16xi32>
    %c0_i32_365 = arith.constant 0 : i32
    %516 = vector.broadcast %c0_i32_365 : i32 to vector<20x16xi32>
    %517 = arith.cmpi eq, %515, %516 : vector<20x16xi32>
    %518 = arith.andi %499, %517 : vector<20x16xi1>
    %cst_366 = arith.constant 0.000000e+00 : f32
    %519 = vector.broadcast %cst_366 : f32 to vector<20x16xf32>
    %520 = arith.select %518, %495, %519 : vector<20x16xi1>, vector<20x16xf32>
    %cst_367 = arith.constant dense<0.000000e+00> : vector<16xf32>
    %521 = vector.multi_reduction <add>, %520, %cst_367 [0] : vector<20x16xf32> to vector<16xf32>
    %522 = vector.shape_cast %521 : vector<16xf32> to vector<1x16xf32>
    %c4_368 = arith.constant 4 : index
    %c0_369 = arith.constant 0 : index
    %c0_370 = arith.constant 0 : index
    %523 = vector.load %arg2[%c4_368, %c0_369, %c0_370] : memref<5x1x16xf32, #tpu.memory_space<vmem>>, vector<1x1x16xf32>
    %524 = vector.shape_cast %523 : vector<1x1x16xf32> to vector<1x16xf32>
    %525 = vector.shape_cast %522 : vector<1x16xf32> to vector<1x1x16xf32>
    tpu.vector_store %arg2[%c4_368, %c0_369, %c0_370], %525 {strides = array<i32>} : memref<5x1x16xf32, #tpu.memory_space<vmem>>, vector<1x1x16xf32>,
    return
  }
  func.func @transform_0(%arg0: i32) -> (i32, i32, i32) {
    %c0_i32 = arith.constant 0 : i32
    %c0_i32_0 = arith.constant 0 : i32
    %c0_i32_1 = arith.constant 0 : i32
    return %c0_i32, %c0_i32_0, %arg0 : i32, i32, i32
  }
  func.func @transform_1(%arg0: i32) -> (i32, i32, i32) {
    %c0_i32 = arith.constant 0 : i32
    %c0_i32_0 = arith.constant 0 : i32
    %c0_i32_1 = arith.constant 0 : i32
    return %c0_i32, %c0_i32_0, %arg0 : i32, i32, i32
  }
}

</mosaic_0001>

<bundles_post_ra>
// kernel: _lambda_.1
= control target key start
LH: loop header
LB: loop body
LE: loop exit
PB: predicated region body
PF: predicated region fallthrough
CT: control target
= control target key end

     0   :  { %v8_v0 = vlaneseq  ;;  %vm36_vm0 = vcmask 1047556   ;;  %vm46_vm1 = vcmask 1044480   ;;  %vm67_vm2 = vcmask 1045504   ;;  %s3390_s0 = inlined_call_operand.vmem [shape: f32[20,20,16], index: 0, kind: input, shape index: {}]   ;;  %s3391_s1 = inlined_call_operand.vmem [shape: f32[5,1,16], index: 1, kind: output, shape index: {}]  }
   0x1   :  { %v12_v1 = vld [vmem:[%s3390_s0] sm:$0xff]  ;;  %v13_v2 = vld [vmem:[%s3390_s0 + $0x8] sm:$0xff]  ;;  %v14_v3 = vld [vmem:[%s3390_s0 + $0x10] sm:$0xf]  ;;  %vm409_vm10 = vcmask 125952   ;;  %vm405_vm11 = vcmask 130048  }
   0x2   :  { %v2053_v4 = vshrl.u32 %v8_v0, 7  ;;  %v1725_v5 = vld [vmem:[%s3390_s0 + $0x18] sm:$0xff]  ;;  %v1726_v6 = vld [vmem:[%s3390_s0 + $0x20] sm:$0xff]  ;;  %v1727_v7 = vld [vmem:[%s3390_s0 + $0x28] sm:$0xf]  ;;  %vm418_vm14 = vcmask 122880  }
   0x3   :  { %v19_v8 = vmax.f32 %v12_v1, %v1725_v5  ;;  %v20_v9 = vmax.f32 %v13_v2, %v1726_v6  ;;  %v21_v10 = vmax.f32 %v14_v3, %v1727_v7  ;;  %v1728_v11 = vld [vmem:[%s3390_s0 + $0x30] sm:$0xff]  ;;  %v1729_v12 = vld [vmem:[%s3390_s0 + $0x38] sm:$0xff]  ;;  %v1730_v13 = vld [vmem:[%s3390_s0 + $0x40] sm:$0xf] }
   0x4   :  { %3407 = vst [vmem:[#allocation2_spill] sm:$0xff] %v2053_v4  ;;  %v1731_v14 = vld [vmem:[%s3390_s0 + $0x48] sm:$0xff]  ;;  %v1732_v15 = vld [vmem:[%s3390_s0 + $0x50] sm:$0xff]  ;;  %v1733_v16 = vld [vmem:[%s3390_s0 + $0x58] sm:$0xf]  ;;  %v2086_v21 = vadd.s32 8, %v2053_v4 }
   0x5   :  { %v26_v17 = vmax.f32 %v19_v8, %v1728_v11  ;;  %v27_v18 = vmax.f32 %v20_v9, %v1729_v12  ;;  %v28_v19 = vmax.f32 %v21_v10, %v1730_v13  ;;  %v1736_v20 = vld [vmem:[%s3390_s0 + $0x70] sm:$0xf]  ;;  %v2089_v22 = vadd.s32 16, %v2053_v4  ;;  %v1734_v23 = vld [vmem:[%s3390_s0 + $0x60] sm:$0xff]  ;;  %v2097_v24 = vld [vmem:[%s3390_s0 + $0x78] sm:$0xff] }
   0x6   :  { %3408 = vst [vmem:[#allocation3_spill] sm:$0xff] %v2086_v21  ;;  %v1739_v25 = vld [vmem:[%s3390_s0 + $0x88] sm:$0xf]  ;;  %v2112_v30 = vld [vmem:[%s3390_s0 + $0x80] sm:$0xff]  ;;  %v90_v31 = vmax.f32 %v1734_v23, %v2097_v24  ;;  %v2123_v35 = vld [vmem:[%s3390_s0 + $0x90] sm:$0xff]  ;;  %v2131_v37 = vadd.s32 4294967293, %v2053_v4 }
   0x7   :  { %3409 = vst [vmem:[#allocation4_spill] sm:$0xff] %v2089_v22  ;;  %v33_v26 = vmax.f32 %v26_v17, %v1731_v14  ;;  %v2102_v27 = vmax.f32 %v27_v18, %v1732_v15  ;;  %v35_v28 = vmax.f32 %v28_v19, %v1733_v16  ;;  %v2107_v29 = vld [vmem:[%s3390_s0 + $0x68] sm:$0xff]  ;;  %v1742_v32 = vld [vmem:[%s3390_s0 + $0xa0] sm:$0xf]  ;;  %v92_v34 = vmax.f32 %v1736_v20, %v1739_v25  ;;  %v2128_v36 = vld [vmem:[%s3390_s0 + $0x98] sm:$0xff] }
   0x8   :  { %v91_v33 = vmax.f32 %v2107_v29, %v2112_v30  ;;  %v2134_v38 = vadd.s32 4294967293, %v2086_v21  ;;  %v97_v41 = vmax.f32 %v90_v31, %v2123_v35  ;;  %v2141_v42 = vld [vmem:[%s3390_s0 + $0xa8] sm:$0xff]  ;;  %v1745_v43 = vld [vmem:[%s3390_s0 + $0xb8] sm:$0xf]  ;;  %v2149_v44 = vld [vmem:[%s3390_s0 + $0xc0] sm:$0xff]  ;;  %v2164_v50 = vadd.s32 4294967293, %v2089_v22 }
   0x9   :  { %v37_v39 = vrot.slane %v33_v26, 4  ;;  %v39_v40 = vrot.slane %v2102_v27, 4  ;;  %v99_v46 = vmax.f32 %v92_v34, %v1742_v32  ;;  %v1748_v47 = vld [vmem:[%s3390_s0 + $0xd0] sm:$0xf]  ;;  %v2158_v48 = vld [vmem:[%s3390_s0 + $0xd8] sm:$0xff]  ;;  %v2166_v51 = vmax.f32 %v33_v26, %v1734_v23  ;;  %v2182_v61 = vld [vmem:[%s3390_s0 + $0xc8] sm:$0xff] }
   0xa   :  { %v98_v45 = vmax.f32 %v91_v33, %v2128_v36  ;;  %v1751_v49 = vld [vmem:[%s3390_s0 + $0xe8] sm:$0xf]  ;;  %v2173_v54 = vld [vmem:[%s3390_s0 + $0xb0] sm:$0xff]  ;;  %v104_v55 = vmax.f32 %v97_v41, %v2141_v42  ;;  %v158_v56 = vmax.f32 %v2149_v44, %v2158_v48  ;;  %v2187_v62 = vld [vmem:[%s3390_s0 + $0xe0] sm:$0xff]  ;;  %vm360_vm3 = vcmp.lt.s32.totalorder %v2131_v37, 0 }
   0xb   :  { %v38_v52 = vsel %vm36_vm0, %v37_v39, %v35_v28  ;;  %v41_v53 = vsel %vm36_vm0, %v39_v40, %v37_v39  ;;  %v106_v63 = vmax.f32 %v99_v46, %v1745_v43  ;;  %v159_v1 = vmax.f32 %v2182_v61, %v2187_v62  ;;  %v2194_v3 = vld [vmem:[%s3390_s0 + $0xf0] sm:$0xff]  ;;  %v1754_v5 = vld [vmem:[%s3390_s0 + $0x100] sm:$0xf]  ;;  %v2204_v9 = vld [vmem:[%s3390_s0 + $0xf8] sm:$0xff] }
   0xc   :  { %v40_v57 = vrot.slane %v38_v52, 4  ;;  %v47_v58 = vrot.slane %v38_v52, 3  ;;  %v48_v59 = vrot.slane %v41_v53, 3  ;;  %v105_v60 = vmax.f32 %v98_v45, %v2173_v54  ;;  %v1757_v19 = vld [vmem:[%s3390_s0 + $0x118] sm:$0xf]  ;;  %v2220_v31 = vld [vmem:[%s3390_s0 + $0x108] sm:$0xff] }
   0xd   :  { %v107_v0 = vrot.slane %v104_v55, 4  ;;  %v160_v2 = vmax.f32 %v1748_v47, %v1751_v49  ;;  %v165_v10 = vmax.f32 %v158_v56, %v2194_v3  ;;  %v166_v14 = vmax.f32 %v159_v1, %v2204_v9  ;;  %v2225_v32 = vld [vmem:[%s3390_s0 + $0x110] sm:$0xff] }
   0xe   :  { %v42_v6 = vsel %vm36_vm0, %v40_v57, %v39_v40  ;;  %v49_v7 = vsel %vm46_vm1, %v47_v58, %v48_v59  ;;  %v109_v8 = vrot.slane %v105_v60, 4  ;;  %v3419_v4 = vsub.s32 0, %v2131_v37 }
   0xf   :  { %v50_v11 = vrot.slane %v42_v6, 3  ;;  %v2207_v12 = vmax.f32 %v33_v26, %v49_v7  ;;  %v108_v13 = vsel %vm36_vm0, %v107_v0, %v106_v63  ;;  %v167_v18 = vmax.f32 %v160_v2, %v1754_v5 }
  0x10   :  { %v110_v15 = vrot.slane %v108_v13, 4  ;;  %v111_v16 = vsel %vm36_vm0, %v109_v8, %v107_v0  ;;  %v116_v17 = vrot.slane %v108_v13, 3  ;;  %v173_v39 = vmax.f32 %v166_v14, %v2225_v32 }
  0x11   :  { %v51_v20 = vsel %vm46_vm1, %v48_v59, %v50_v11  ;;  %v57_v23 = vmax.f32 %v35_v28, %v50_v11  ;;  %v58_v25 = vrot.slane %v2207_v12, 4  ;;  %v117_v26 = vrot.slane %v111_v16, 3 }
  0x12   :  { %v2228_v33 = vmax.f32 %v2102_v27, %v51_v20  ;;  %v112_v34 = vsel %vm36_vm0, %v110_v15, %v109_v8  ;;  %v172_v28 = vmax.f32 %v165_v10, %v2220_v31  ;;  %v174_v45 = vmax.f32 %v167_v18, %v1757_v19  ;;  %v2260_v20 = vld [vmem:[%s3390_s0 + $0x120] sm:$0xff] }
  0x13   :  { %v59_v40 = vsel %vm36_vm0, %v58_v25, %v57_v23  ;;  %v118_v41 = vsel %vm46_vm1, %v116_v17, %v117_v26  ;;  %v119_v43 = vrot.slane %v112_v34, 3  ;;  %v177_v58 = vrot.slane %v173_v39, 4 }
  0x14   :  { %v60_v46 = vrot.slane %v2228_v33, 4  ;;  %v61_v47 = vrot.slane %v59_v40, 4  ;;  %v68_v49 = vrot.slane %v59_v40, 2  ;;  %v2236_v52 = vmax.f32 %v104_v55, %v118_v41  ;;  %v2383_v55 = vld [vmem:[%s3390_s0 + $0x1c8] sm:$0xff] }
  0x15   :  { %v120_v53 = vsel %vm46_vm1, %v117_v26, %v119_v43  ;;  %v126_v56 = vmax.f32 %v106_v63, %v119_v43  ;;  %v175_v57 = vrot.slane %v172_v28, 4  ;;  %v1763_v26 = vld [vmem:[%s3390_s0 + $0x148] sm:$0xf]  ;;  %3418 = vst [vmem:[#allocation13_spill] sm:$0xff] %v2383_v55  ;;  %vm357_vm4 = vcmp.ge.s32.totalorder %v2131_v37, 0 }
  0x16   :  { %v62_v59 = vsel %vm36_vm0, %v60_v46, %v58_v25  ;;  %v63_v0 = vsel %vm36_vm0, %v61_v47, %v60_v46  ;;  %v2241_v1 = vmax.f32 %v105_v60, %v120_v53  ;;  %v127_v2 = vrot.slane %v2236_v52, 4  ;;  %v1760_v25 = vld [vmem:[%s3390_s0 + $0x130] sm:$0xf]  ;;  %v2273_v43 = vld [vmem:[%s3390_s0 + $0x128] sm:$0xff]  ;;  %v2278_v46 = vld [vmem:[%s3390_s0 + $0x138] sm:$0xff] }
  0x17   :  { %v69_v5 = vrot.slane %v62_v59, 2  ;;  %v71_v6 = vrot.slane %v63_v0, 2  ;;  %v176_v7 = vsel %vm36_vm0, %v175_v57, %v174_v45  ;;  %v179_v11 = vsel %vm36_vm0, %v177_v58, %v175_v57  ;;  %v2283_v47 = vld [vmem:[%s3390_s0 + $0x140] sm:$0xff] }
  0x18   :  { %v128_v8 = vsel %vm36_vm0, %v127_v2, %v126_v56  ;;  %v129_v63 = vrot.slane %v2241_v1, 4  ;;  %v178_v10 = vrot.slane %v176_v7, 4  ;;  %v184_v60 = vrot.slane %v176_v7, 3 }
  0x19   :  { %v70_v13 = vsel %vm67_vm2, %v68_v49, %v69_v5  ;;  %v130_v14 = vrot.slane %v128_v8, 4  ;;  %v2252_v16 = vsel %vm67_vm2, %v69_v5, %v71_v6  ;;  %v2254_v17 = vmax.f32 %v57_v23, %v71_v6  ;;  %v2295_v6 = vld [vmem:[%s3390_s0 + $0x150] sm:$0xff] }
  0x1a   :  { %v131_v18 = vsel %vm36_vm0, %v129_v63, %v127_v2  ;;  %v136_v19 = vrot.slane %v128_v8, 2  ;;  %v180_v40 = vsel %vm36_vm0, %v178_v10, %v177_v58  ;;  %v185_v41 = vrot.slane %v179_v11, 3  ;;  %v2308_v11 = vld [vmem:[%s3390_s0 + $0x180] sm:$0xff] }
  0x1b   :  { %v132_v34 = vsel %vm36_vm0, %v130_v14, %v129_v63  ;;  %v137_v23 = vrot.slane %v131_v18, 2  ;;  %v187_v53 = vrot.slane %v180_v40, 3  ;;  %v226_v57 = vmax.f32 %v2260_v20, %v2278_v46  ;;  %3410 = vst [vmem:[#allocation5_spill] sm:$0xff] %v2308_v11  ;;  %v1775_v18 = vld [vmem:[%s3390_s0 + $0x1a8] sm:$0xf] }
  0x1c   :  { %v139_v49 = vrot.slane %v132_v34, 2  ;;  %v227_v58 = vmax.f32 %v2273_v43, %v2283_v47  ;;  %v76_v59 = vmax.f32 %v2207_v12, %v70_v13  ;;  %v186_v2 = vsel %vm46_vm1, %v184_v60, %v185_v41  ;;  %v1766_v12 = vld [vmem:[%s3390_s0 + $0x160] sm:$0xf]  ;;  %v2313_v13 = vld [vmem:[%s3390_s0 + $0x198] sm:$0xff] }
  0x1d   :  { %v138_v0 = vsel %vm67_vm2, %v136_v19, %v137_v23  ;;  %v228_v5 = vmax.f32 %v1760_v25, %v1763_v26  ;;  %v77_v7 = vmax.f32 %v2228_v33, %v2252_v16  ;;  %v188_v10 = vsel %vm46_vm1, %v185_v41, %v187_v53  ;;  %3411 = vst [vmem:[#allocation6_spill] sm:$0xff] %v2313_v13  ;;  %v2322_v60 = vld [vmem:[%s3390_s0 + $0x158] sm:$0xff]  ;;  %v1772_v16 = vld [vmem:[%s3390_s0 + $0x190] sm:$0xf]  ;;  %v2338_v26 = vld [vmem:[%s3390_s0 + $0x168] sm:$0xff] }
  0x1e   :  { %v140_v8 = vsel %vm67_vm2, %v137_v23, %v139_v49  ;;  %v144_v63 = vmax.f32 %v2236_v52, %v138_v0  ;;  %v2315_v33 = vmax.f32 %v172_v28, %v186_v2  ;;  %v2317_v14 = vmax.f32 %v173_v39, %v188_v10  ;;  %3412 = vst [vmem:[#allocation7_spill] sm:$0xff] %v2338_v26  ;;  %v1769_v34 = vld [vmem:[%s3390_s0 + $0x178] sm:$0xf]  ;;  %v2367_v2 = vld [vmem:[%s3390_s0 + $0x1b0] sm:$0xff] }
  0x1f   :  { %v194_v52 = vmax.f32 %v174_v45, %v187_v53  ;;  %v294_v28 = vmax.f32 %v2308_v11, %v2313_v13  ;;  %v145_v39 = vmax.f32 %v2241_v1, %v140_v8  ;;  %v146_v19 = vmax.f32 %v126_v56, %v139_v49  ;;  %v2348_v56 = vld [vmem:[%s3390_s0 + $0x170] sm:$0xff]  ;;  %v2353_v49 = vld [vmem:[%s3390_s0 + $0x188] sm:$0xff]  ;;  %v2358_v53 = vld [vmem:[%s3390_s0 + $0x1a0] sm:$0xff]  ;;  %3416 = vst [vmem:[#allocation11_spill] sm:$0xff] %v2367_v2 }
  0x20   :  { %v233_v45 = vmax.f32 %v226_v57, %v2295_v6  ;;  %v234_v25 = vmax.f32 %v227_v58, %v2322_v60  ;;  %v147_v23 = vadd.f32 %v144_v63, %v76_v59  ;;  %v195_v40 = vrot.slane %v2315_v33, 4  ;;  %3413 = vst [vmem:[#allocation8_spill] sm:$0xff] %v2348_v56  ;;  %3414 = vst [vmem:[#allocation9_spill] sm:$0xff] %v2353_v49 }
  0x21   :  { %v197_v41 = vrot.slane %v2317_v14, 4  ;;  %v235_v1 = vmax.f32 %v228_v5, %v1766_v12  ;;  %3415 = vst [vmem:[#allocation10_spill] sm:$0xff] %v2358_v53  ;;  %v295_v59 = vmax.f32 %v2353_v49, %v2358_v53  ;;  %v296_v0 = vmax.f32 %v1772_v16, %v1775_v18  ;;  %v1778_v5 = vld [vmem:[%s3390_s0 + $0x1c0] sm:$0xf]  ;;  %v2378_v18 = vld [vmem:[%s3390_s0 + $0x1b8] sm:$0xff] }
  0x22   :  { %v240_v57 = vmax.f32 %v233_v45, %v2338_v26  ;;  %v241_v58 = vmax.f32 %v234_v25, %v2348_v56  ;;  %v196_v8 = vsel %vm36_vm0, %v195_v40, %v194_v52  ;;  %v301_v12 = vmax.f32 %v294_v28, %v2367_v2  ;;  %3417 = vst [vmem:[#allocation12_spill] sm:$0xff] %v2378_v18  ;;  %v1781_v28 = vld [vmem:[%s3390_s0 + $0x1d8] sm:$0xf] }
  0x23   :  { %v199_v63 = vsel %vm36_vm0, %v197_v41, %v195_v40  ;;  %v242_v10 = vmax.f32 %v235_v1, %v1769_v34  ;;  %v198_v45 = vrot.slane %v196_v8, 4  ;;  %v204_v25 = vrot.slane %v196_v8, 2 }
  0x24   :  { %v205_v15 = vrot.slane %v199_v63, 2  ;;  %v243_v16 = vrot.slane %v240_v57, 4  ;;  %v245_v22 = vrot.slane %v241_v58, 4  ;;  %v302_v40 = vmax.f32 %v295_v59, %v2378_v18 }
  0x25   :  { %v303_v34 = vmax.f32 %v296_v0, %v1778_v5  ;;  %v308_v1 = vmax.f32 %v301_v12, %v2383_v55  ;;  %v200_v8 = vsel %vm36_vm0, %v198_v45, %v197_v41  ;;  %v1785_v2 = vmin.u32 %v2131_v37, %v3419_v4  ;;  %v2402_v41 = vld [vmem:[%s3390_s0 + $0x1d0] sm:$0xff] }
  0x26   :  { %v206_v63 = vsel %vm67_vm2, %v204_v25, %v205_v15  ;;  %v244_v21 = vsel %vm36_vm0, %v243_v16, %v242_v10  ;;  %v207_v59 = vrot.slane %v200_v8, 2  ;;  %v247_v18 = vsel %vm36_vm0, %v245_v22, %v243_v16  ;;  %v1809_v37 = vld [vmem:[%s3390_s0 + $0xd0] sm:$0xf] }
  0x27   :  { %v212_v0 = vmax.f32 %v2315_v33, %v206_v63  ;;  %v246_v5 = vrot.slane %v244_v21, 4  ;;  %v252_v12 = vrot.slane %v244_v21, 3  ;;  %v253_v45 = vrot.slane %v247_v18, 3 }
  0x28   :  { %v309_v25 = vmax.f32 %v302_v40, %v2402_v41  ;;  %v310_v55 = vmax.f32 %v303_v34, %v1781_v28  ;;  %v148_v53 = vadd.f32 %v145_v39, %v77_v7  ;;  %v149_v13 = vadd.f32 %v146_v19, %v2254_v17 }
  0x29   :  { %v208_v4 = vsel %vm67_vm2, %v205_v15, %v207_v59  ;;  %v248_v33 = vsel %vm36_vm0, %v246_v5, %v245_v22  ;;  %v214_v8 = vmax.f32 %v194_v52, %v207_v59  ;;  %v254_v16 = vsel %vm46_vm1, %v252_v12, %v253_v45 }
  0x2a   :  { %v255_v63 = vrot.slane %v248_v33, 3  ;;  %v311_v56 = vrot.slane %v308_v1, 4  ;;  %v215_v49 = vadd.f32 %v212_v0, %v147_v23  ;;  %v260_v26 = vmax.f32 %v240_v57, %v254_v16 }
  0x2b   :  { %v313_v11 = vrot.slane %v309_v25, 4  ;;  %v364_v21 = vand.u32 3, %v1785_v2  ;;  %v213_v18 = vmax.f32 %v2317_v14, %v208_v4  ;;  %v217_v52 = vadd.f32 %v214_v8, %v149_v13  ;;  %v422_v4 = vld [vmem:[%s3390_s0 + $0x10] sm:$0xf] }
  0x2c   :  { %v256_v40 = vsel %vm46_vm1, %v253_v45, %v255_v63  ;;  %v262_v7 = vmax.f32 %v242_v10, %v255_v63  ;;  %v312_v17 = vsel %vm36_vm0, %v311_v56, %v310_v55  ;;  %v263_v15 = vrot.slane %v260_v26, 4 }
  0x2d   :  { %v261_v39 = vmax.f32 %v241_v58, %v256_v40  ;;  %v314_v19 = vrot.slane %v312_v17, 4  ;;  %v315_v22 = vsel %vm36_vm0, %v313_v11, %v311_v56  ;;  %v320_v34 = vrot.slane %v312_v17, 3 }
  0x2e   :  { %v321_v28 = vrot.slane %v315_v22, 3  ;;  %v365_v59 = vsub.s32 0, %v364_v21  ;;  %v264_v23 = vsel %vm36_vm0, %v263_v15, %v262_v7  ;;  %v378_v14 = vand.u32 3, %v2164_v50  ;;  %v1788_v50 = vld [vmem:[%s3390_s0 + $0x28] sm:$0xf] }
  0x2f   :  { %v265_v57 = vrot.slane %v261_v39, 4  ;;  %v316_v2 = vsel %vm36_vm0, %v314_v19, %v313_v11  ;;  %v266_v0 = vrot.slane %v264_v23, 4  ;;  %v272_v10 = vrot.slane %v264_v23, 2 }
  0x30   :  { %v322_v5 = vsel %vm46_vm1, %v320_v34, %v321_v28  ;;  %v323_v58 = vrot.slane %v316_v2, 3  ;;  %v216_v12 = vadd.f32 %v213_v18, %v148_v53  ;;  %v366_v13 = vsel %vm360_vm3, %v365_v59, %v364_v21  ;;  %v1812_v59 = vld [vmem:[%s3390_s0 + $0xe8] sm:$0xf] }
  0x31   :  { %v267_v45 = vsel %vm36_vm0, %v265_v57, %v263_v15  ;;  %v2418_v56 = vmax.f32 %v308_v1, %v322_v5  ;;  %v268_v11 = vsel %vm36_vm0, %v266_v0, %v265_v57  ;;  %vm381_vm5 = vcmp.ne.s32.totalorder %v366_v13, 0  ;;  %v1800_v5 = vld [vmem:[%s3390_s0 + $0x88] sm:$0xf] }
  0x32   :  { %v273_v33 = vrot.slane %v267_v45, 2  ;;  %v324_v53 = vsel %vm46_vm1, %v321_v28, %v323_v58  ;;  %v330_v8 = vmax.f32 %v310_v55, %v323_v58  ;;  %v275_v1 = vrot.slane %v268_v11, 2  ;;  %v1791_v55 = vld [vmem:[%s3390_s0 + $0x40] sm:$0xf] }
  0x33   :  { %v329_v16 = vmax.f32 %v309_v25, %v324_v53  ;;  %v331_v63 = vrot.slane %v2418_v56, 4  ;;  %vm384_vm6 = vcmp.lt.s32.totalorder %v366_v13, 0  ;;  %v390_v18 = vadd.s32 4, %v366_v13 }
  0x34   :  { %v274_v21 = vsel %vm67_vm2, %v272_v10, %v273_v33  ;;  %vm2433_vm7 = vcmp.eq.s32.totalorder %v378_v14, 0  ;;  %v428_v17 = vmax.f32 %v422_v4, %v1788_v50  ;;  %v276_v15 = vsel %vm67_vm2, %v273_v33, %v275_v1  ;;  %vm2442_vm8 = vmand %vm384_vm6, %vm381_vm5 }
  0x35   :  { %v280_v19 = vmax.f32 %v260_v26, %v274_v21  ;;  %v282_v25 = vmax.f32 %v262_v7, %v275_v1  ;;  %v332_v22 = vsel %vm36_vm0, %v331_v63, %v330_v8  ;;  %v3424_v28 = vand.u32 3, %v2134_v38  ;;  %v1794_v26 = vld [vmem:[%s3390_s0 + $0x58] sm:$0xf] }
  0x36   :  { %v281_v23 = vmax.f32 %v261_v39, %v276_v15  ;;  %v333_v57 = vrot.slane %v329_v16, 4  ;;  %v334_v2 = vrot.slane %v332_v22, 4  ;;  %v340_v14 = vrot.slane %v332_v22, 2  ;;  %v1803_v39 = vld [vmem:[%s3390_s0 + $0xa0] sm:$0xf] }
  0x37   :  { %vm2448_vm9 = vcmp.eq.s32.totalorder %v3424_v28, 0  ;;  %v283_v7 = vadd.f32 %v280_v19, %v215_v49  ;;  %v285_v0 = vadd.f32 %v282_v25, %v217_v52  ;;  %v393_v10 = vsel %vm2442_vm8, %v390_v18, %v366_v13  ;;  %v1797_v52 = vld [vmem:[%s3390_s0 + $0x70] sm:$0xf]  ;;  %v1806_v21 = vld [vmem:[%s3390_s0 + $0xb8] sm:$0xf] }
  0x38   :  { %v434_v38 = vmax.f32 %v428_v17, %v1791_v55  ;;  %v284_v58 = vadd.f32 %v281_v23, %v216_v12  ;;  %v335_v45 = vsel %vm36_vm0, %v333_v57, %v331_v63  ;;  %v336_v4 = vsel %vm36_vm0, %v334_v2, %v333_v57 }
  0x39   :  { %vm2465_vm12 = vcmp.eq.s32.totalorder %v393_v10, 0  ;;  %v341_v13 = vrot.slane %v335_v45, 2  ;;  %v343_v50 = vrot.slane %v336_v4, 2  ;;  %v445_v33 = vmax.f32 %v2102_v27, %v2107_v29  ;;  %v1818_v45 = vld [vmem:[%s3390_s0 + $0x118] sm:$0xf] }
  0x3a   :  { %v440_v11 = vmax.f32 %v434_v38, %v1794_v26  ;;  %v447_v12 = vrot.slane %v2166_v51, 4  ;;  %v516_v53 = vmax.f32 %v2097_v24, %v2123_v35  ;;  %v517_v1 = vmax.f32 %v2112_v30, %v2128_v36  ;;  %vm2490_vm13 = vmand %vm357_vm4, %vm2465_vm12 }
  0x3b   :  { %v518_v63 = vmax.f32 %v1800_v5, %v1803_v39  ;;  %v342_v18 = vsel %vm67_vm2, %v340_v14, %v341_v13  ;;  %v344_v17 = vsel %vm67_vm2, %v341_v13, %v343_v50  ;;  %v350_v55 = vmax.f32 %v330_v8, %v343_v50 }
  0x3c   :  { %v446_v15 = vmax.f32 %v440_v11, %v1797_v52  ;;  %v348_v27 = vmax.f32 %v2418_v56, %v342_v18  ;;  %v349_v29 = vmax.f32 %v329_v16, %v344_v17  ;;  %v449_v19 = vrot.slane %v445_v33, 4 }
  0x3d   :  { %v522_v24 = vmax.f32 %v516_v53, %v2141_v42  ;;  %v353_v35 = vadd.f32 %v350_v55, %v285_v0  ;;  %v523_v8 = vmax.f32 %v517_v1, %v2173_v54  ;;  %v524_v25 = vmax.f32 %v518_v63, %v1806_v21 }
  0x3e   :  { %v448_v36 = vsel %vm36_vm0, %v447_v12, %v446_v15  ;;  %v351_v22 = vadd.f32 %v348_v27, %v283_v7  ;;  %v352_v56 = vadd.f32 %v349_v29, %v284_v58  ;;  %v451_v34 = vsel %vm36_vm0, %v449_v19, %v447_v12  ;;  %v1815_v58 = vld [vmem:[%s3390_s0 + $0x100] sm:$0xf] }
  0x3f   :  { %v450_v16 = vrot.slane %v448_v36, 4  ;;  %v404_v42 = vsel %vm2433_vm7, %v353_v35, 0.0  ;;  %v456_v28 = vrot.slane %v448_v36, 3  ;;  %v457_v23 = vrot.slane %v451_v34, 3 }
  0x40   :  { %v528_v57 = vmax.f32 %v522_v24, %v2149_v44  ;;  %v402_v54 = vsel %vm2490_vm13, %v351_v22, 0.0  ;;  %v403_v2 = vsel %vm2448_vm9, %v352_v56, 0.0  ;;  %v410_v14 = vsel %vm409_vm10, %v404_v42, 0.0 }
  0x41   :  { %v452_v26 = vsel %vm36_vm0, %v450_v16, %v449_v19  ;;  %v406_v40 = vsel %vm405_vm11, %v402_v54, 0.0  ;;  %v407_v7 = vsel %vm405_vm11, %v403_v2, 0.0  ;;  %v458_v0 = vsel %vm46_vm1, %v456_v28, %v457_v23 }
  0x42   :  { %v459_v10 = vrot.slane %v452_v26, 3  ;;  %v408_v38 = vadd.f32 %v407_v7, %v406_v40  ;;  %v464_v44 = vmax.f32 %v2166_v51, %v458_v0  ;;  %v529_v5 = vmax.f32 %v523_v8, %v2182_v61 }
  0x43   :  { %v530_v39 = vmax.f32 %v524_v25, %v1809_v37  ;;  %v534_v51 = vmax.f32 %v528_v57, %v2158_v48  ;;  %v606_v61 = vmax.f32 %v2194_v3, %v2220_v31  ;;  %v607_v1 = vmax.f32 %v2204_v9, %v2225_v32  ;;  %v1821_v9 = vld [vmem:[%s3390_s0 + $0x130] sm:$0xf]  ;;  %v1824_v37 = vld [vmem:[%s3390_s0 + $0x148] sm:$0xf] }
  0x44   :  { %v460_v4 = vsel %vm46_vm1, %v457_v23, %v459_v10  ;;  %v466_v49 = vmax.f32 %v446_v15, %v459_v10  ;;  %v411_v52 = vadd.f32 %v410_v14, %v408_v38  ;;  %v467_v50 = vrot.slane %v464_v44, 4 }
  0x45   :  { %v465_v13 = vmax.f32 %v445_v33, %v460_v4  ;;  %v535_v11 = vmax.f32 %v529_v5, %v2187_v62  ;;  %v536_v12 = vmax.f32 %v530_v39, %v1812_v59  ;;  %v537_v53 = vrot.slane %v534_v51, 4 }
  0x46   :  { %v608_v63 = vmax.f32 %v1815_v58, %v1818_v45  ;;  %v412_v21 = vrot.slane %v411_v52, 4  ;;  %v468_v18 = vsel %vm36_vm0, %v467_v50, %v466_v49  ;;  %v612_v31 = vmax.f32 %v606_v61, %v2260_v20  ;;  %v1827_v58 = vld [vmem:[%s3390_s0 + $0x160] sm:$0xf] }
  0x47   :  { %v469_v17 = vrot.slane %v465_v13, 4  ;;  %v539_v55 = vrot.slane %v535_v11, 4  ;;  %v470_v48 = vrot.slane %v468_v18, 4  ;;  %v476_v15 = vrot.slane %v468_v18, 2 }
  0x48   :  { %v538_v3 = vsel %vm36_vm0, %v537_v53, %v536_v12  ;;  %v413_v33 = vadd.f32 %v412_v21, %v411_v52  ;;  %v613_v20 = vmax.f32 %v607_v1, %v2273_v43  ;;  %v614_v16 = vmax.f32 %v608_v63, %v1821_v9  ;;  %v1830_v9 = vld [vmem:[%s3390_s0 + $0x178] sm:$0xf] }
  0x49   :  { %v471_v62 = vsel %vm36_vm0, %v469_v17, %v467_v50  ;;  %v540_v27 = vrot.slane %v538_v3, 4  ;;  %v541_v29 = vsel %vm36_vm0, %v539_v55, %v537_v53  ;;  %v472_v32 = vsel %vm36_vm0, %v470_v48, %v469_v17 }
  0x4a   :  { %v477_v19 = vrot.slane %v471_v62, 2  ;;  %v546_v24 = vrot.slane %v538_v3, 3  ;;  %v547_v35 = vrot.slane %v541_v29, 3  ;;  %v414_v30 = vrot.slane %v413_v33, 2 }
  0x4b   :  { %v479_v36 = vrot.slane %v472_v32, 2  ;;  %v542_v8 = vsel %vm36_vm0, %v540_v27, %v539_v55  ;;  %v618_v7 = vmax.f32 %v612_v31, %v2278_v46  ;;  %v619_v38 = vmax.f32 %v613_v20, %v2283_v47  ;;  %v1833_v32 = vld [vmem:[%s3390_s0 + $0x190] sm:$0xf]  ;;  %v3431_v20 = vld [vmem:[#allocation5_spill] sm:$0xff] }
  0x4c   :  { %v478_v25 = vsel %vm67_vm2, %v476_v15, %v477_v19  ;;  %v548_v22 = vsel %vm46_vm1, %v546_v24, %v547_v35  ;;  %v549_v56 = vrot.slane %v542_v8, 3  ;;  %v415_v34 = vadd.f32 %v414_v30, %v413_v33 }
  0x4d   :  { %v480_v42 = vsel %vm67_vm2, %v477_v19, %v479_v36  ;;  %v2544_v28 = vmax.f32 %v464_v44, %v478_v25  ;;  %v486_v23 = vmax.f32 %v466_v49, %v479_v36  ;;  %v554_v54 = vmax.f32 %v534_v51, %v548_v22  ;;  %v3432_v25 = vld [vmem:[#allocation7_spill] sm:$0xff] }
  0x4e   :  { %v2549_v57 = vmax.f32 %v465_v13, %v480_v42  ;;  %v550_v43 = vsel %vm46_vm1, %v547_v35, %v549_v56  ;;  %v556_v2 = vmax.f32 %v536_v12, %v549_v56  ;;  %v416_v14 = vrot.slane %v415_v34, 1  ;;  %v3433_v56 = vld [vmem:[#allocation9_spill] sm:$0xff] }
  0x4f   :  { %v487_v26 = vrot.slane %v2544_v28, 4  ;;  %v555_v40 = vmax.f32 %v535_v11, %v550_v43  ;;  %v557_v10 = vrot.slane %v554_v54, 4  ;;  %v620_v44 = vmax.f32 %v614_v16, %v1824_v37  ;;  %v3434_v16 = vld [vmem:[#allocation8_spill] sm:$0xff] }
  0x50   :  { %v489_v0 = vrot.slane %v2549_v57, 4  ;;  %v417_v5 = vadd.f32 %v416_v14, %v415_v34  ;;  %v624_v45 = vmax.f32 %v618_v7, %v2295_v6  ;;  %v625_v6 = vmax.f32 %v619_v38, %v2322_v60  ;;  %v3435_v14 = vld [vmem:[#allocation6_spill] sm:$0xff] }
  0x51   :  { %v488_v39 = vsel %vm36_vm0, %v487_v26, %v486_v23  ;;  %v559_v59 = vrot.slane %v555_v40, 4  ;;  %v558_v51 = vsel %vm36_vm0, %v557_v10, %v556_v2  ;;  %v626_v12 = vmax.f32 %v620_v44, %v1827_v58 }
  0x52   :  { %v490_v4 = vrot.slane %v488_v39, 4  ;;  %v491_v49 = vsel %vm36_vm0, %v489_v0, %v487_v26  ;;  %v496_v46 = vrot.slane %v488_v39, 3  ;;  %419 = vst.msk [vmem:[%s3391_s1] sm:$0x1] %vm418_vm14, %v417_v5  ;;  %v560_v61 = vrot.slane %v558_v51, 4  ;;  %v3436_v39 = vld [vmem:[#allocation10_spill] sm:$0xff] }
  0x53   :  { %v497_v47 = vrot.slane %v491_v49, 3  ;;  %v561_v52 = vsel %vm36_vm0, %v559_v59, %v557_v10  ;;  %v566_v13 = vrot.slane %v558_v51, 2  ;;  %v627_v21 = vrot.slane %v624_v45, 4 }
  0x54   :  { %v492_v50 = vsel %vm36_vm0, %v490_v4, %v489_v0  ;;  %v567_v11 = vrot.slane %v561_v52, 2  ;;  %v562_v63 = vsel %vm36_vm0, %v560_v61, %v559_v59  ;;  %v629_v48 = vrot.slane %v625_v6, 4  ;;  %v3437_v61 = vld [vmem:[#allocation11_spill] sm:$0xff] }
  0x55   :  { %v498_v53 = vsel %vm46_vm1, %v496_v46, %v497_v47  ;;  %v499_v1 = vrot.slane %v492_v50, 3  ;;  %v569_v55 = vrot.slane %v562_v63, 2  ;;  %v628_v33 = vsel %vm36_vm0, %v627_v21, %v626_v12 }
  0x56   :  { %v504_v18 = vmax.f32 %v2544_v28, %v498_v53  ;;  %v568_v17 = vsel %vm67_vm2, %v566_v13, %v567_v11  ;;  %v630_v29 = vrot.slane %v628_v33, 4  ;;  %v631_v35 = vsel %vm36_vm0, %v629_v48, %v627_v21 }
  0x57   :  { %v500_v15 = vsel %vm46_vm1, %v497_v47, %v499_v1  ;;  %v506_v3 = vmax.f32 %v486_v23, %v499_v1  ;;  %v574_v31 = vmax.f32 %v554_v54, %v568_v17  ;;  %v570_v62 = vsel %vm67_vm2, %v567_v11, %v569_v55  ;;  %v1839_v47 = vld [vmem:[%s3390_s0 + $0x1c0] sm:$0xf]  ;;  %v1842_v17 = vld [vmem:[%s3390_s0 + $0x1d8] sm:$0xf] }
  0x58   :  { %v505_v60 = vmax.f32 %v2549_v57, %v500_v15  ;;  %v576_v27 = vmax.f32 %v556_v2, %v569_v55  ;;  %v575_v19 = vmax.f32 %v555_v40, %v570_v62  ;;  %v636_v30 = vrot.slane %v628_v33, 3  ;;  %v1836_v2 = vld [vmem:[%s3390_s0 + $0x1a8] sm:$0xf] }
  0x59   :  { %v577_v24 = vrot.slane %v574_v31, 4  ;;  %v632_v36 = vsel %vm36_vm0, %v630_v29, %v629_v48  ;;  %v637_v8 = vrot.slane %v631_v35, 3  ;;  %v696_v22 = vmax.f32 %v3432_v25, %v3431_v20  ;;  %v3440_v35 = vld [vmem:[#allocation2_spill] sm:$0xff] }
  0x5a   :  { %v697_v34 = vmax.f32 %v3434_v16, %v3433_v56  ;;  %v579_v28 = vrot.slane %v575_v19, 4  ;;  %v639_v23 = vrot.slane %v632_v36, 3  ;;  %v698_v37 = vmax.f32 %v1830_v9, %v1833_v32 }
  0x5b   :  { %v578_v42 = vsel %vm36_vm0, %v577_v24, %v576_v27  ;;  %v638_v54 = vsel %vm46_vm1, %v636_v30, %v637_v8  ;;  %v702_v26 = vmax.f32 %v696_v22, %v3435_v14  ;;  %v2623_v30 = vadd.s32 4294967292, %v3440_v35  ;;  %v3442_v22 = vld [vmem:[#allocation4_spill] sm:$0xff] }
  0x5c   :  { %v580_v57 = vrot.slane %v578_v42, 4  ;;  %v586_v43 = vrot.slane %v578_v42, 3  ;;  %v581_v40 = vsel %vm36_vm0, %v579_v28, %v577_v24  ;;  %v640_v7 = vsel %vm46_vm1, %v637_v8, %v639_v23  ;;  %v3441_v8 = vld [vmem:[#allocation3_spill] sm:$0xff] }
  0x5d   :  { %v644_v0 = vmax.f32 %v624_v45, %v638_v54  ;;  %v646_v10 = vmax.f32 %v626_v12, %v639_v23  ;;  %v587_v44 = vrot.slane %v581_v40, 3  ;;  %v645_v5 = vmax.f32 %v625_v6, %v640_v7  ;;  %v3438_v45 = vld [vmem:[#allocation12_spill] sm:$0xff] }
  0x5e   :  { %v582_v38 = vsel %vm36_vm0, %v580_v57, %v579_v28  ;;  %v703_v59 = vmax.f32 %v697_v34, %v3436_v39  ;;  %v704_v49 = vmax.f32 %v698_v37, %v1836_v2  ;;  %v708_v52 = vmax.f32 %v702_v26, %v3437_v61 }
  0x5f   :  { %v589_v58 = vrot.slane %v582_v38, 3  ;;  %v647_v4 = vrot.slane %v644_v0, 4  ;;  %v588_v46 = vsel %vm46_vm1, %v586_v43, %v587_v44  ;;  %v649_v51 = vrot.slane %v645_v5, 4 }
  0x60   :  { %v709_v13 = vmax.f32 %v703_v59, %v3438_v45  ;;  %v594_v11 = vmax.f32 %v574_v31, %v588_v46  ;;  %v710_v33 = vmax.f32 %v704_v49, %v1839_v47  ;;  %v2626_v20 = vadd.s32 4294967292, %v3441_v8 }
  0x61   :  { %v590_v50 = vsel %vm46_vm1, %v587_v44, %v589_v58  ;;  %v596_v6 = vmax.f32 %v576_v27, %v589_v58  ;;  %v648_v12 = vsel %vm36_vm0, %v647_v4, %v646_v10  ;;  %v651_v63 = vsel %vm36_vm0, %v649_v51, %v647_v4  ;;  %v3439_v27 = vld [vmem:[#allocation13_spill] sm:$0xff] }
  0x62   :  { %v595_v53 = vmax.f32 %v575_v19, %v590_v50  ;;  %v650_v1 = vrot.slane %v648_v12, 4  ;;  %v656_v21 = vrot.slane %v648_v12, 2  ;;  %v2612_v55 = vadd.f32 %v594_v11, %v504_v18 }
  0x63   :  { %v2614_v48 = vadd.f32 %v596_v6, %v506_v3  ;;  %v657_v15 = vrot.slane %v651_v63, 2  ;;  %v714_v29 = vmax.f32 %v708_v52, %v3439_v27  ;;  %v715_v9 = vmax.f32 %v709_v13, %v2402_v41 }
  0x64   :  { %v2616_v62 = vadd.f32 %v595_v53, %v505_v60  ;;  %v652_v31 = vsel %vm36_vm0, %v650_v1, %v649_v51  ;;  %v716_v24 = vmax.f32 %v710_v33, %v1842_v17  ;;  %v2630_v56 = vadd.s32 4294967292, %v3442_v22  ;;  %v856_v53 = vld [vmem:[%s3390_s0] sm:$0xff]  ;;  %v1848_v33 = vld [vmem:[%s3390_s0 + $0x18] sm:$0xff] }
  0x65   :  { %v658_v32 = vsel %vm67_vm2, %v656_v21, %v657_v15  ;;  %v659_v19 = vrot.slane %v652_v31, 2  ;;  %v717_v3 = vrot.slane %v714_v29, 4  ;;  %v719_v36 = vrot.slane %v715_v9, 4  ;;  %v1849_v31 = vld [vmem:[%s3390_s0 + $0x20] sm:$0xff] }
  0x66   :  { %v664_v18 = vmax.f32 %v644_v0, %v658_v32  ;;  %v787_v57 = vsub.s32 0, %v2623_v30  ;;  %v2637_v2 = vmul.u32.u64.low 3435973837, %v2626_v20  ;;  %v2638_v14 = vmul.u32.u64.high 3435973837, %v2626_v20, %v2637_v2 }
  0x67   :  { %v660_v60 = vsel %vm67_vm2, %v657_v15, %v659_v19  ;;  %v666_v25 = vmax.f32 %v646_v10, %v659_v19  ;;  %v718_v34 = vsel %vm36_vm0, %v717_v3, %v716_v24  ;;  %v721_v42 = vsel %vm36_vm0, %v719_v36, %v717_v3  ;;  %v857_v15 = vld [vmem:[%s3390_s0 + $0x8] sm:$0xff]  ;;  %v858_v19 = vld [vmem:[%s3390_s0 + $0x10] sm:$0xf] }
  0x68   :  { %v665_v41 = vmax.f32 %v645_v5, %v660_v60  ;;  %v667_v16 = vrot.slane %v664_v18, 4  ;;  %v720_v28 = vrot.slane %v718_v34, 4  ;;  %v726_v23 = vrot.slane %v718_v34, 3 }
  0x69   :  { %v727_v37 = vrot.slane %v721_v42, 3  ;;  %v1846_v5 = vmin.u32 %v2623_v30, %v787_v57  ;;  %v2646_v58 = vmul.u32.u64.low 3435973837, %v2630_v56  ;;  %v2647_v4 = vmul.u32.u64.high 3435973837, %v2630_v56, %v2646_v58 }
  0x6a   :  { %v668_v43 = vsel %vm36_vm0, %v667_v16, %v666_v25  ;;  %v669_v54 = vrot.slane %v665_v41, 4  ;;  %v722_v7 = vsel %vm36_vm0, %v720_v28, %v719_v36  ;;  %vm786_vm15 = vcmp.lt.s32.totalorder %v2623_v30, 0 }
  0x6b   :  { %v670_v26 = vrot.slane %v668_v43, 4  ;;  %v676_v40 = vrot.slane %v668_v43, 3  ;;  %v728_v0 = vsel %vm46_vm1, %v726_v23, %v727_v37  ;;  %v729_v38 = vrot.slane %v722_v7, 3  ;;  %v1851_v23 = vld [vmem:[%s3390_s0 + $0x30] sm:$0xff] }
  0x6c   :  { %v671_v10 = vsel %vm36_vm0, %v669_v54, %v667_v16  ;;  %v734_v44 = vmax.f32 %v714_v29, %v728_v0  ;;  %v2651_v45 = vmul.u32.u64.low 3435973837, %v1846_v5  ;;  %v2652_v13 = vmul.u32.u64.high 3435973837, %v1846_v5, %v2651_v45 }
  0x6d   :  { %v672_v39 = vsel %vm36_vm0, %v670_v26, %v669_v54  ;;  %v677_v59 = vrot.slane %v671_v10, 3  ;;  %v730_v46 = vsel %vm46_vm1, %v727_v37, %v729_v38  ;;  %v736_v51 = vmax.f32 %v716_v24, %v729_v38  ;;  %v1850_v24 = vld [vmem:[%s3390_s0 + $0x28] sm:$0xf] }
  0x6e   :  { %v679_v49 = vrot.slane %v672_v39, 3  ;;  %v737_v47 = vrot.slane %v734_v44, 4  ;;  %v735_v52 = vmax.f32 %v715_v9, %v730_v46  ;;  %v803_v9 = vshrl.u32 %v2638_v14, 2  ;;  %v2862_v46 = vld [vmem:[%s3390_s0 + $0x120] sm:$0xff] }
  0x6f   :  { %v678_v61 = vsel %vm46_vm1, %v676_v40, %v677_v59  ;;  %v814_v32 = vshrl.u32 %v2647_v4, 2  ;;  %v792_v3 = vshrl.u32 %v2652_v13, 2  ;;  %v862_v34 = vmax.f32 %v856_v53, %v1848_v33  ;;  %v1852_v40 = vld [vmem:[%s3390_s0 + $0x38] sm:$0xff]  ;;  %v1858_v53 = vld [vmem:[%s3390_s0 + $0x68] sm:$0xff] }
  0x70   :  { %v680_v50 = vsel %vm46_vm1, %v677_v59, %v679_v49  ;;  %v684_v11 = vmax.f32 %v664_v18, %v678_v61  ;;  %v686_v6 = vmax.f32 %v666_v25, %v679_v49  ;;  %v738_v12 = vsel %vm36_vm0, %v737_v47, %v736_v51  ;;  %v1856_v13 = vld [vmem:[%s3390_s0 + $0x58] sm:$0xf] }
  0x71   :  { %v685_v1 = vmax.f32 %v665_v41, %v680_v50  ;;  %v739_v63 = vrot.slane %v735_v52, 4  ;;  %v740_v21 = vrot.slane %v738_v12, 4  ;;  %v746_v17 = vrot.slane %v738_v12, 2  ;;  %v1857_v12 = vld [vmem:[%s3390_s0 + $0x60] sm:$0xff]  ;;  %v1860_v33 = vld [vmem:[%s3390_s0 + $0x78] sm:$0xff] }
  0x72   :  { %v2670_v27 = vadd.f32 %v684_v11, %v2612_v55  ;;  %v2673_v29 = vadd.f32 %v686_v6, %v2614_v48  ;;  %v804_v25 = vmul.u32 5, %v803_v9  ;;  %v815_v41 = vmul.u32 5, %v814_v32 }
  0x73   :  { %v2684_v18 = vadd.f32 %v685_v1, %v2616_v62  ;;  %v741_v55 = vsel %vm36_vm0, %v739_v63, %v737_v47  ;;  %v742_v48 = vsel %vm36_vm0, %v740_v21, %v739_v63  ;;  %v793_v16 = vmul.u32 5, %v792_v3  ;;  %v1855_v47 = vld [vmem:[%s3390_s0 + $0x50] sm:$0xff]  ;;  %v2764_v3 = vld [vmem:[%s3390_s0 + $0xd8] sm:$0xff] }
  0x74   :  { %v747_v36 = vrot.slane %v741_v55, 2  ;;  %v749_v60 = vrot.slane %v742_v48, 2  ;;  %v863_v42 = vmax.f32 %v857_v15, %v1849_v31  ;;  %v864_v28 = vmax.f32 %v858_v19, %v1850_v24  ;;  %v1859_v1 = vld [vmem:[%s3390_s0 + $0x70] sm:$0xf]  ;;  %v1861_v31 = vld [vmem:[%s3390_s0 + $0x80] sm:$0xff] }
  0x75   :  { %vm783_vm3 = vcmp.ge.s32.totalorder %v2623_v30, 0  ;;  %v805_v43 = vsub.s32 %v2626_v20, %v804_v25  ;;  %v794_v14 = vsub.s32 %v1846_v5, %v793_v16  ;;  %v816_v26 = vsub.s32 %v2630_v56, %v815_v41  ;;  %v1853_v56 = vld [vmem:[%s3390_s0 + $0x40] sm:$0xf]  ;;  %v1862_v55 = vld [vmem:[%s3390_s0 + $0x88] sm:$0xf]  ;;  %v1863_v25 = vld [vmem:[%s3390_s0 + $0x90] sm:$0xff] }
  0x76   :  { %v748_v62 = vsel %vm67_vm2, %v746_v17, %v747_v36  ;;  %v750_v37 = vsel %vm67_vm2, %v747_v36, %v749_v60  ;;  %v2694_v57 = vmax.f32 %v736_v51, %v749_v60  ;;  %v868_v0 = vmax.f32 %v862_v34, %v1851_v23  ;;  %v1854_v51 = vld [vmem:[%s3390_s0 + $0x48] sm:$0xff]  ;;  %v2759_v48 = vld [vmem:[%s3390_s0 + $0xc0] sm:$0xff]  ;;  %v1871_v41 = vld [vmem:[%s3390_s0 + $0xd0] sm:$0xf] }
  0x77   :  { %v754_v54 = vmax.f32 %v734_v44, %v748_v62  ;;  %v2698_v2 = vmax.f32 %v735_v52, %v750_v37  ;;  %vm820_vm4 = vcmp.ne.s32.totalorder %v805_v43, 0  ;;  %vm823_vm5 = vcmp.lt.s32.totalorder %v805_v43, 0  ;;  %v1874_v16 = vld [vmem:[%s3390_s0 + $0xe8] sm:$0xf]  ;;  %v1864_v30 = vld [vmem:[%s3390_s0 + $0x98] sm:$0xff] }
  0x78   :  { %v829_v7 = vadd.s32 5, %v805_v43  ;;  %v795_v39 = vsub.s32 0, %v794_v14  ;;  %vm821_vm6 = vcmp.ne.s32.totalorder %v816_v26, 0  ;;  %vm826_vm7 = vmand %vm823_vm5, %vm820_vm4  ;;  %vm824_vm8 = vcmp.lt.s32.totalorder %v816_v26, 0 }
  0x79   :  { %v757_v10 = vrot.slane %v754_v54, 4  ;;  %v759_v38 = vrot.slane %v2698_v2, 4  ;;  %v830_v20 = vadd.s32 5, %v816_v26  ;;  %v869_v5 = vmax.f32 %v863_v42, %v1852_v40  ;;  %vm2713_vm9 = vmand %vm824_vm8, %vm821_vm6 }
  0x7a   :  { %v832_v44 = vsel %vm826_vm7, %v829_v7, %v805_v43  ;;  %v796_v4 = vsel %vm786_vm15, %v795_v39, %v794_v14  ;;  %v870_v6 = vmax.f32 %v864_v28, %v1853_v56  ;;  %v874_v15 = vmax.f32 %v868_v0, %v1854_v51  ;;  %v2789_v43 = vld [vmem:[%s3390_s0 + $0xc8] sm:$0xff]  ;;  %v1868_v51 = vld [vmem:[%s3390_s0 + $0xb8] sm:$0xf] }
  0x7b   :  { %v758_v59 = vsel %vm36_vm0, %v757_v10, %v2694_v57  ;;  %v761_v58 = vsel %vm36_vm0, %v759_v38, %v757_v10  ;;  %vm2717_vm12 = vcmp.eq.s32.totalorder %v832_v44, 0  ;;  %vm819_vm13 = vcmp.ne.s32.totalorder %v796_v4, 0 }
  0x7c   :  { %v760_v61 = vrot.slane %v758_v59, 4  ;;  %v766_v52 = vrot.slane %v758_v59, 3  ;;  %v767_v45 = vrot.slane %v761_v58, 3  ;;  %vm822_vm15 = vcmp.lt.s32.totalorder %v796_v4, 0  ;;  %v2824_v59 = vld [vmem:[%s3390_s0 + $0xf8] sm:$0xff] }
  0x7d   :  { %v828_v50 = vadd.s32 5, %v796_v4  ;;  %v833_v11 = vsel %vm2713_vm9, %v830_v20, %v816_v26  ;;  %vm825_vm4 = vmand %vm822_vm15, %vm819_vm13  ;;  %v875_v24 = vmax.f32 %v869_v5, %v1855_v47  ;;  %v876_v36 = vmax.f32 %v870_v6, %v1856_v13  ;;  %v1865_v26 = vld [vmem:[%s3390_s0 + $0xa0] sm:$0xf]  ;;  %v2817_v20 = vld [vmem:[%s3390_s0 + $0xf0] sm:$0xff] }
  0x7e   :  { %v762_v63 = vsel %vm36_vm0, %v760_v61, %v759_v38  ;;  %v768_v21 = vsel %vm46_vm1, %v766_v52, %v767_v45  ;;  %vm2743_vm5 = vcmp.eq.s32.totalorder %v833_v11, 0  ;;  %v880_v60 = vmax.f32 %v874_v15, %v1857_v12  ;;  %v1867_v38 = vld [vmem:[%s3390_s0 + $0xb0] sm:$0xff]  ;;  %v1877_v58 = vld [vmem:[%s3390_s0 + $0x100] sm:$0xf]  ;;  %v1880_v6 = vld [vmem:[%s3390_s0 + $0x118] sm:$0xf] }
  0x7f   :  { %v769_v9 = vrot.slane %v762_v63, 3  ;;  %v774_v32 = vmax.f32 %v754_v54, %v768_v21  ;;  %v831_v19 = vsel %vm825_vm4, %v828_v50, %v796_v4  ;;  %v959_v34 = vmax.f32 %v2759_v48, %v2764_v3  ;;  %v2794_v54 = vld [vmem:[%s3390_s0 + $0xe0] sm:$0xff]  ;;  %v2832_v4 = vld [vmem:[%s3390_s0 + $0x108] sm:$0xff]  ;;  %v2844_v52 = vld [vmem:[%s3390_s0 + $0x110] sm:$0xff] }
  0x80   :  { %vm834_vm6 = vcmp.eq.s32.totalorder %v831_v19, 0  ;;  %v881_v37 = vmax.f32 %v875_v24, %v1858_v53  ;;  %v886_v14 = vmax.f32 %v880_v60, %v1860_v33  ;;  %v960_v40 = vmax.f32 %v2789_v43, %v2794_v54  ;;  %v2867_v21 = vld [vmem:[%s3390_s0 + $0x128] sm:$0xff] }
  0x81   :  { %v770_v42 = vsel %vm46_vm1, %v767_v45, %v769_v9  ;;  %v776_v28 = vmax.f32 %v2694_v57, %v769_v9  ;;  %v777_v23 = vadd.f32 %v774_v32, %v2670_v27  ;;  %vm2782_vm7 = vmand %vm783_vm3, %vm834_vm6  ;;  %v882_v27 = vmax.f32 %v876_v36, %v1859_v1 }
  0x82   :  { %v775_v57 = vmax.f32 %v2698_v2, %v770_v42  ;;  %v887_v10 = vmax.f32 %v881_v37, %v1861_v31  ;;  %v1866_v2 = vld [vmem:[%s3390_s0 + $0xa8] sm:$0xff]  ;;  %v961_v39 = vmax.f32 %v1871_v41, %v1874_v16  ;;  %v892_v5 = vmax.f32 %v886_v14, %v1863_v25  ;;  %v2884_v16 = vld [vmem:[%s3390_s0 + $0x138] sm:$0xff] }
  0x83   :  { %v779_v7 = vadd.f32 %v776_v28, %v2673_v29  ;;  %v840_v0 = vsel %vm2782_vm7, %v777_v23, 0.0  ;;  %v888_v56 = vmax.f32 %v882_v27, %v1862_v55  ;;  %v965_v47 = vmax.f32 %v959_v34, %v2817_v20  ;;  %v1883_v55 = vld [vmem:[%s3390_s0 + $0x130] sm:$0xf]  ;;  %v2889_v34 = vld [vmem:[%s3390_s0 + $0x140] sm:$0xff] }
  0x84   :  { %v778_v29 = vadd.f32 %v775_v57, %v2684_v18  ;;  %v843_v44 = vsel %vm405_vm11, %v840_v0, 0.0  ;;  %v893_v49 = vmax.f32 %v887_v10, %v1864_v30  ;;  %v966_v61 = vmax.f32 %v960_v40, %v2824_v59  ;;  %v1886_v30 = vld [vmem:[%s3390_s0 + $0x148] sm:$0xf]  ;;  %v2905_v40 = vld [vmem:[%s3390_s0 + $0x158] sm:$0xff] }
  0x85   :  { %v842_v18 = vsel %vm2743_vm5, %v779_v7, 0.0  ;;  %v894_v50 = vmax.f32 %v888_v56, %v1865_v26  ;;  %v2849_v11 = vmax.f32 %v892_v5, %v1866_v2  ;;  %v967_v1 = vmax.f32 %v961_v39, %v1877_v58  ;;  %v2900_v26 = vld [vmem:[%s3390_s0 + $0x150] sm:$0xff]  ;;  %v1889_v56 = vld [vmem:[%s3390_s0 + $0x160] sm:$0xf] }
  0x86   :  { %v841_v45 = vsel %vm2717_vm12, %v778_v29, 0.0  ;;  %v846_v13 = vsel %vm409_vm10, %v842_v18, 0.0  ;;  %v2855_v53 = vmax.f32 %v893_v49, %v1867_v38  ;;  %v1508_v63 = vmax.f32 %v2832_v4, %v2817_v20 }
  0x87   :  { %v844_v12 = vsel %vm405_vm11, %v841_v45, 0.0  ;;  %v900_v15 = vmax.f32 %v894_v50, %v1868_v51  ;;  %v901_v33 = vrot.slane %v2849_v11, 4  ;;  %v1509_v31 = vmax.f32 %v2844_v52, %v2824_v59  ;;  %v2926_v51 = vld [vmem:[%s3390_s0 + $0x168] sm:$0xff] }
  0x88   :  { %v845_v17 = vadd.f32 %v844_v12, %v843_v44  ;;  %v903_v9 = vrot.slane %v2855_v53, 4  ;;  %v971_v32 = vmax.f32 %v965_v47, %v2832_v4  ;;  %v972_v19 = vmax.f32 %v966_v61, %v2844_v52  ;;  %v2931_v47 = vld [vmem:[%s3390_s0 + $0x170] sm:$0xff] }
  0x89   :  { %v973_v24 = vmax.f32 %v967_v1, %v1880_v6  ;;  %v902_v60 = vsel %vm36_vm0, %v901_v33, %v900_v15  ;;  %v1514_v25 = vmax.f32 %v1508_v63, %v2862_v46  ;;  %v1515_v41 = vmax.f32 %v1509_v31, %v2867_v21  ;;  %v1892_v6 = vld [vmem:[%s3390_s0 + $0x178] sm:$0xf] }
  0x8a   :  { %v847_v36 = vadd.f32 %v846_v13, %v845_v17  ;;  %v904_v42 = vrot.slane %v902_v60, 4  ;;  %v905_v28 = vsel %vm36_vm0, %v903_v9, %v901_v33  ;;  %v910_v23 = vrot.slane %v902_v60, 3 }
  0x8b   :  { %v977_v62 = vmax.f32 %v971_v32, %v2862_v46  ;;  %v911_v57 = vrot.slane %v905_v28, 3  ;;  %v978_v27 = vmax.f32 %v972_v19, %v2867_v21  ;;  %v979_v14 = vmax.f32 %v973_v24, %v1883_v55 }
  0x8c   :  { %v848_v37 = vrot.slane %v847_v36, 4  ;;  %v906_v7 = vsel %vm36_vm0, %v904_v42, %v903_v9  ;;  %v1520_v0 = vmax.f32 %v1514_v25, %v2884_v16  ;;  %v1521_v10 = vmax.f32 %v1515_v41, %v2889_v34 }
  0x8d   :  { %v983_v2 = vmax.f32 %v977_v62, %v2884_v16  ;;  %v912_v39 = vsel %vm46_vm1, %v910_v23, %v911_v57  ;;  %v913_v29 = vrot.slane %v906_v7, 3  ;;  %v984_v44 = vmax.f32 %v978_v27, %v2889_v34 }
  0x8e   :  { %v849_v38 = vadd.f32 %v848_v37, %v847_v36  ;;  %v918_v5 = vmax.f32 %v2849_v11, %v912_v39  ;;  %v985_v58 = vmax.f32 %v979_v14, %v1886_v30  ;;  %v2918_v18 = vmax.f32 %v1520_v0, %v2900_v26 }
  0x8f   :  { %v2921_v49 = vmax.f32 %v1521_v10, %v2905_v40  ;;  %v914_v45 = vsel %vm46_vm1, %v911_v57, %v913_v29  ;;  %v920_v13 = vmax.f32 %v900_v15, %v913_v29  ;;  %v989_v50 = vmax.f32 %v983_v2, %v2900_v26 }
  0x90   :  { %v850_v61 = vrot.slane %v849_v38, 2  ;;  %v919_v12 = vmax.f32 %v2855_v53, %v914_v45  ;;  %v921_v1 = vrot.slane %v918_v5, 4  ;;  %v990_v63 = vmax.f32 %v984_v44, %v2905_v40 }
  0x91   :  { %v991_v17 = vmax.f32 %v985_v58, %v1889_v56  ;;  %v1532_v31 = vmax.f32 %v2918_v18, %v2926_v51  ;;  %v1533_v9 = vmax.f32 %v2921_v49, %v2931_v47  ;;  %v995_v15 = vmax.f32 %v989_v50, %v2926_v51  ;;  %v1918_v18 = vld [vmem:[%s3390_s0 + $0xb8] sm:$0xf]  ;;  %v1924_v49 = vld [vmem:[%s3390_s0 + $0xe8] sm:$0xf] }
  0x92   :  { %v851_v33 = vadd.f32 %v850_v61, %v849_v38  ;;  %v922_v32 = vsel %vm36_vm0, %v921_v1, %v920_v13  ;;  %v923_v19 = vrot.slane %v919_v12, 4  ;;  %v996_v24 = vmax.f32 %v990_v63, %v2931_v47 }
  0x93   :  { %v997_v55 = vmax.f32 %v991_v17, %v1892_v6  ;;  %v924_v60 = vrot.slane %v922_v32, 4  ;;  %v930_v25 = vrot.slane %v922_v32, 2  ;;  %v998_v41 = vrot.slane %v995_v15, 4 }
  0x94   :  { %v852_v36 = vrot.slane %v851_v33, 1  ;;  %v925_v42 = vsel %vm36_vm0, %v923_v19, %v921_v1  ;;  %v1000_v28 = vrot.slane %v996_v24, 4  ;;  %v2949_v23 = vadd.s32 4294967289, %v3440_v35 }
  0x95   :  { %v926_v37 = vsel %vm36_vm0, %v924_v60, %v923_v19  ;;  %v931_v57 = vrot.slane %v925_v42, 2  ;;  %v999_v27 = vsel %vm36_vm0, %v998_v41, %v997_v55  ;;  %v1894_v61 = vadd.s32 4294967289, %v3441_v8  ;;  %v1900_v60 = vld [vmem:[%s3390_s0 + $0x28] sm:$0xf] }
  0x96   :  { %v853_v62 = vadd.f32 %v852_v36, %v851_v33  ;;  %v933_v14 = vrot.slane %v926_v37, 2  ;;  %v1001_v30 = vrot.slane %v999_v27, 4  ;;  %v1002_v7 = vsel %vm36_vm0, %v1000_v28, %v998_v41 }
  0x97   :  { %v1007_v0 = vrot.slane %v999_v27, 3  ;;  %v932_v10 = vsel %vm67_vm2, %v930_v25, %v931_v57  ;;  %v1008_v35 = vrot.slane %v1002_v7, 3  ;;  %v1895_v6 = vadd.s32 4294967289, %v3442_v22  ;;  %v1903_v27 = vld [vmem:[%s3390_s0 + $0x40] sm:$0xf] }
  0x98   :  { %1847 = vst.msk [vmem:[%s3391_s1 + $0x1] sm:$0x1] %vm418_vm14, %v853_v62  ;;  %v934_v2 = vsel %vm67_vm2, %v931_v57, %v933_v14  ;;  %v2960_v38 = vmax.f32 %v918_v5, %v932_v10  ;;  %v2962_v39 = vmax.f32 %v920_v13, %v933_v14  ;;  %v1003_v29 = vsel %vm36_vm0, %v1001_v30, %v1000_v28 }
  0x99   :  { %v2965_v44 = vmax.f32 %v919_v12, %v934_v2  ;;  %v1009_v56 = vsel %vm46_vm1, %v1007_v0, %v1008_v35  ;;  %v1010_v58 = vrot.slane %v1003_v29, 3  ;;  %v1057_v1 = vsub.s32 0, %v2949_v23  ;;  %v1906_v29 = vld [vmem:[%s3390_s0 + $0x58] sm:$0xf] }
  0x9a   :  { %v941_v45 = vrot.slane %v2960_v38, 4  ;;  %v1015_v50 = vmax.f32 %v995_v15, %v1009_v56  ;;  %v1116_v15 = vld [vmem:[%s3390_s0 + $0x10] sm:$0xf]  ;;  %vm1056_vm3 = vcmp.lt.s32.totalorder %v2949_v23, 0  ;;  %v1074_v42 = vand.u32 7, %v1895_v6 }
  0x9b   :  { %v943_v5 = vrot.slane %v2965_v44, 4  ;;  %v1011_v13 = vsel %vm46_vm1, %v1008_v35, %v1010_v58  ;;  %v1017_v63 = vmax.f32 %v997_v55, %v1010_v58  ;;  %v1896_v32 = vmin.u32 %v2949_v23, %v1057_v1 }
  0x9c   :  { %v2976_v12 = vsel %vm36_vm0, %v941_v45, %v2962_v39  ;;  %v1016_v17 = vmax.f32 %v996_v24, %v1011_v13  ;;  %v1018_v33 = vrot.slane %v1015_v50, 4  ;;  %v1067_v55 = vand.u32 7, %v1894_v61 }
  0x9d   :  { %v944_v19 = vrot.slane %v2976_v12, 4  ;;  %v2984_v36 = vsel %vm36_vm0, %v943_v5, %v941_v45  ;;  %v1060_v41 = vand.u32 7, %v1896_v32  ;;  %v947_v62 = vmax.f32 %v2960_v38, %v2976_v12  ;;  %v1939_v38 = vld [vmem:[%s3390_s0 + $0x160] sm:$0xf] }
  0x9e   :  { %v1019_v24 = vsel %vm36_vm0, %v1018_v33, %v1017_v63  ;;  %v1020_v25 = vrot.slane %v1016_v17, 4  ;;  %vm1053_vm8 = vcmp.ge.s32.totalorder %v2949_v23, 0  ;;  %v948_v14 = vmax.f32 %v2965_v44, %v2984_v36 }
  0x9f   :  { %v2992_v28 = vsel %vm36_vm0, %v944_v19, %v943_v5  ;;  %v1021_v37 = vrot.slane %v1019_v24, 4  ;;  %v1027_v57 = vrot.slane %v1019_v24, 2  ;;  %v1061_v7 = vsub.s32 0, %v1060_v41  ;;  %v1946_v19 = vld [vmem:[%s3390_s0 + $0x198] sm:$0xff] }
  0xa0   :  { %v1022_v30 = vsel %vm36_vm0, %v1020_v25, %v1018_v33  ;;  %v1122_v0 = vmax.f32 %v1116_v15, %v1900_v60  ;;  %v949_v10 = vmax.f32 %v2962_v39, %v2992_v28  ;;  %v1162_v56 = vmax.f32 %v2849_v11, %v2759_v48  ;;  %v1909_v48 = vld [vmem:[%s3390_s0 + $0x70] sm:$0xf]  ;;  %v1944_v39 = vld [vmem:[%s3390_s0 + $0x188] sm:$0xff] }
  0xa1   :  { %v1023_v35 = vsel %vm36_vm0, %v1021_v37, %v1020_v25  ;;  %v1028_v2 = vrot.slane %v1022_v30, 2  ;;  %v1062_v61 = vsel %vm1056_vm3, %v1061_v7, %v1060_v41  ;;  %v1163_v6 = vmax.f32 %v2855_v53, %v2789_v43  ;;  %v1933_v30 = vld [vmem:[%s3390_s0 + $0x130] sm:$0xf] }
  0xa2   :  { %v1030_v58 = vrot.slane %v1023_v35, 2  ;;  %v1128_v45 = vmax.f32 %v1122_v0, %v1903_v27  ;;  %vm1077_vm9 = vcmp.ne.s32.totalorder %v1062_v61, 0  ;;  %vm1080_vm12 = vcmp.lt.s32.totalorder %v1062_v61, 0 }
  0xa3   :  { %v1029_v1 = vsel %vm67_vm2, %v1027_v57, %v1028_v2  ;;  %v1086_v5 = vadd.s32 8, %v1062_v61  ;;  %vm3016_vm13 = vcmp.eq.s32.totalorder %v1067_v55, 0  ;;  %vm1083_vm15 = vmand %vm1080_vm12, %vm1077_vm9  ;;  %vm3024_vm4 = vcmp.eq.s32.totalorder %v1074_v42, 0  ;;  %v1912_v55 = vld [vmem:[%s3390_s0 + $0x88] sm:$0xf] }
  0xa4   :  { %v1031_v11 = vsel %vm67_vm2, %v1028_v2, %v1030_v58  ;;  %v1035_v33 = vmax.f32 %v1015_v50, %v1029_v1  ;;  %v1037_v32 = vmax.f32 %v1017_v63, %v1030_v58  ;;  %v1134_v15 = vmax.f32 %v1128_v45, %v1906_v29  ;;  %v1927_v50 = vld [vmem:[%s3390_s0 + $0x100] sm:$0xf]  ;;  %v1930_v63 = vld [vmem:[%s3390_s0 + $0x118] sm:$0xf] }
  0xa5   :  { %v1036_v43 = vmax.f32 %v1016_v17, %v1031_v11  ;;  %v1089_v53 = vsel %vm1083_vm15, %v1086_v5, %v1062_v61  ;;  %v3032_v60 = vmax.f32 %v1162_v56, %v2764_v3  ;;  %v1249_v17 = vmax.f32 %v2817_v20, %v2832_v4  ;;  %v1915_v57 = vld [vmem:[%s3390_s0 + $0xa0] sm:$0xf] }
  0xa6   :  { %v1038_v24 = vrot.slane %v1035_v33, 4  ;;  %v1140_v25 = vmax.f32 %v1134_v15, %v1909_v48  ;;  %v3043_v41 = vmax.f32 %v1163_v6, %v2794_v54  ;;  %v1250_v3 = vmax.f32 %v2824_v59, %v2844_v52  ;;  %v1921_v6 = vld [vmem:[%s3390_s0 + $0xd0] sm:$0xf] }
  0xa7   :  { %v1040_v42 = vrot.slane %v1036_v43, 4  ;;  %vm3047_vm5 = vcmp.eq.s32.totalorder %v1089_v53, 0  ;;  %v3058_v20 = vmax.f32 %v1532_v31, %v3032_v60  ;;  %v1171_v54 = vrot.slane %v3032_v60, 4 }
  0xa8   :  { %v1039_v4 = vsel %vm36_vm0, %v1038_v24, %v1037_v32  ;;  %v1146_v59 = vmax.f32 %v1140_v25, %v1912_v55  ;;  %v1173_v52 = vrot.slane %v3043_v41, 4  ;;  %v1251_v27 = vmax.f32 %v1927_v50, %v1930_v63  ;;  %vm3075_vm6 = vmand %vm1053_vm8, %vm3047_vm5 }
  0xa9   :  { %v1041_v7 = vrot.slane %v1039_v4, 4  ;;  %v1042_v0 = vsel %vm36_vm0, %v1040_v42, %v1038_v24  ;;  %v1044_v35 = vmax.f32 %v1035_v33, %v1039_v4  ;;  %v1255_v31 = vmax.f32 %v1249_v17, %v2862_v46  ;;  %v1936_v46 = vld [vmem:[%s3390_s0 + $0x148] sm:$0xf] }
  0xaa   :  { %v1045_v2 = vmax.f32 %v1036_v43, %v1042_v0  ;;  %v1152_v56 = vmax.f32 %v1146_v59, %v1915_v57  ;;  %v3082_v58 = vsel %vm36_vm0, %v1173_v52, %v1171_v54  ;;  %v1256_v61 = vmax.f32 %v1250_v3, %v2867_v21  ;;  %v1942_v43 = vld [vmem:[%s3390_s0 + $0x178] sm:$0xf]  ;;  %v1947_v57 = vld [vmem:[%s3390_s0 + $0x1a0] sm:$0xff]  ;;  %v1948_v59 = vld [vmem:[%s3390_s0 + $0x1a8] sm:$0xf] }
  0xab   :  { %v1043_v45 = vsel %vm36_vm0, %v1041_v7, %v1040_v42  ;;  %v1047_v23 = vadd.f32 %v1044_v35, %v947_v62  ;;  %v1539_v1 = vmax.f32 %v1533_v9, %v3043_v41  ;;  %v1257_v21 = vmax.f32 %v1251_v27, %v1933_v30  ;;  %v3160_v0 = vld [vmem:[%s3390_s0 + $0x1b8] sm:$0xff] }
  0xac   :  { %v1046_v5 = vmax.f32 %v1037_v32, %v1043_v45  ;;  %v1048_v48 = vadd.f32 %v1045_v2, %v948_v14  ;;  %v1158_v11 = vmax.f32 %v1152_v56, %v1918_v18  ;;  %v1261_v33 = vmax.f32 %v1255_v31, %v2884_v16  ;;  %v1943_v16 = vld [vmem:[%s3390_s0 + $0x180] sm:$0xff]  ;;  %v3173_v45 = vld [vmem:[%s3390_s0 + $0x1c8] sm:$0xff] }
  0xad   :  { %v1098_v12 = vsel %vm3075_vm6, %v1047_v23, 0.0  ;;  %v1181_v9 = vrot.slane %v3082_v58, 3  ;;  %v1262_v62 = vmax.f32 %v1256_v61, %v2889_v34  ;;  %v1263_v44 = vmax.f32 %v1257_v21, %v1936_v46  ;;  %v1951_v46 = vld [vmem:[%s3390_s0 + $0x1c0] sm:$0xf] }
  0xae   :  { %v1049_v36 = vadd.f32 %v1046_v5, %v949_v10  ;;  %v1099_v14 = vsel %vm3016_vm13, %v1048_v48, 0.0  ;;  %v1101_v32 = vsel %vm405_vm11, %v1098_v12, 0.0  ;;  %v1164_v15 = vmax.f32 %v1158_v11, %v1921_v6  ;;  %v1954_v11 = vld [vmem:[%s3390_s0 + $0x1d8] sm:$0xf] }
  0xaf   :  { %v1102_v34 = vsel %vm405_vm11, %v1099_v14, 0.0  ;;  %v1267_v53 = vmax.f32 %v1261_v33, %v2900_v26  ;;  %v1268_v55 = vmax.f32 %v1262_v62, %v2905_v40  ;;  %v1269_v50 = vmax.f32 %v1263_v44, %v1939_v38  ;;  %v1945_v40 = vld [vmem:[%s3390_s0 + $0x190] sm:$0xf] }
  0xb0   :  { %v1100_v28 = vsel %vm3024_vm4, %v1049_v36, 0.0  ;;  %v1103_v10 = vadd.f32 %v1102_v34, %v1101_v32  ;;  %v1170_v13 = vmax.f32 %v1164_v15, %v1924_v49  ;;  %v1544_v63 = vmax.f32 %v3058_v20, %v1943_v16 }
  0xb1   :  { %v1104_v17 = vsel %vm409_vm10, %v1100_v28, 0.0  ;;  %v1273_v24 = vmax.f32 %v1267_v53, %v2926_v51  ;;  %v1274_v26 = vmax.f32 %v1268_v55, %v2931_v47  ;;  %v1275_v25 = vmax.f32 %v1269_v50, %v1942_v43 }
  0xb2   :  { %v1105_v3 = vadd.f32 %v1104_v17, %v1103_v10  ;;  %v1172_v42 = vsel %vm36_vm0, %v1171_v54, %v1170_v13  ;;  %v1545_v37 = vmax.f32 %v1539_v1, %v1944_v39  ;;  %v3150_v7 = vmax.f32 %v1544_v63, %v1946_v19  ;;  %v3155_v54 = vld [vmem:[%s3390_s0 + $0x1b0] sm:$0xff] }
  0xb3   :  { %v1174_v51 = vrot.slane %v1172_v42, 4  ;;  %v1180_v20 = vrot.slane %v1172_v42, 3  ;;  %v1279_v47 = vmax.f32 %v1273_v24, %v1943_v16  ;;  %v1280_v4 = vmax.f32 %v1274_v26, %v1944_v39  ;;  %v1450_v17 = vld [vmem:[%s3390_s0 + $0x10] sm:$0xf]  ;;  %v1962_v24 = vld [vmem:[%s3390_s0 + $0x28] sm:$0xf] }
  0xb4   :  { %v1106_v27 = vrot.slane %v1105_v3, 4  ;;  %v1281_v30 = vmax.f32 %v1275_v25, %v1945_v40  ;;  %v3180_v23 = vmax.f32 %v1545_v37, %v1947_v57  ;;  %v1556_v16 = vmax.f32 %v3150_v7, %v3155_v54 }
  0xb5   :  { %v1176_v35 = vsel %vm36_vm0, %v1174_v51, %v1173_v52  ;;  %v1182_v18 = vsel %vm46_vm1, %v1180_v20, %v1181_v9  ;;  %v1285_v31 = vmax.f32 %v1279_v47, %v1946_v19  ;;  %v1286_v2 = vmax.f32 %v1280_v4, %v1947_v57  ;;  %v3178_v52 = vld [vmem:[%s3390_s0 + $0x1d0] sm:$0xff]  ;;  %v1965_v51 = vld [vmem:[%s3390_s0 + $0x40] sm:$0xf] }
  0xb6   :  { %v1107_v29 = vadd.f32 %v1106_v27, %v1105_v3  ;;  %v1183_v56 = vrot.slane %v1176_v35, 3  ;;  %v1188_v58 = vmax.f32 %v3032_v60, %v1182_v18  ;;  %v1287_v61 = vmax.f32 %v1281_v30, %v1948_v59 }
  0xb7   :  { %v1291_v6 = vmax.f32 %v1285_v31, %v3155_v54  ;;  %v1292_v60 = vmax.f32 %v1286_v2, %v3160_v0  ;;  %v1557_v32 = vmax.f32 %v3180_v23, %v3160_v0  ;;  %v3202_v39 = vadd.s32 4294967287, %v3442_v22 }
  0xb8   :  { %v1108_v1 = vrot.slane %v1107_v29, 2  ;;  %v1184_v21 = vsel %vm46_vm1, %v1181_v9, %v1183_v56  ;;  %v1190_v5 = vmax.f32 %v1170_v13, %v1183_v56  ;;  %v1191_v48 = vrot.slane %v1188_v58, 4 }
  0xb9   :  { %v1189_v33 = vmax.f32 %v3043_v41, %v1184_v21  ;;  %v1293_v38 = vmax.f32 %v1287_v61, %v1951_v46  ;;  %v1297_v12 = vmax.f32 %v1291_v6, %v3173_v45  ;;  %v1298_v49 = vmax.f32 %v1292_v60, %v3178_v52  ;;  %v1968_v60 = vld [vmem:[%s3390_s0 + $0x58] sm:$0xf] }
  0xba   :  { %v1109_v62 = vadd.f32 %v1108_v1, %v1107_v29  ;;  %v1192_v44 = vsel %vm36_vm0, %v1191_v48, %v1190_v5  ;;  %v3195_v9 = vadd.s32 4294967287, %v3441_v8  ;;  %v1456_v59 = vmax.f32 %v1450_v17, %v1962_v24 }
  0xbb   :  { %v1193_v36 = vrot.slane %v1189_v33, 4  ;;  %v1194_v14 = vrot.slane %v1192_v44, 4  ;;  %v1299_v41 = vmax.f32 %v1293_v38, %v1954_v11  ;;  %v1200_v43 = vrot.slane %v1192_v44, 2 }
  0xbc   :  { %v1110_v15 = vrot.slane %v1109_v62, 1  ;;  %v1300_v34 = vrot.slane %v1297_v12, 4  ;;  %v1302_v53 = vrot.slane %v1298_v49, 4  ;;  %v1390_v8 = vsub.s32 0, %v3195_v9 }
  0xbd   :  { %v1195_v55 = vsel %vm36_vm0, %v1193_v36, %v1191_v48  ;;  %v1196_v50 = vsel %vm36_vm0, %v1194_v14, %v1193_v36  ;;  %v1462_v31 = vmax.f32 %v1456_v59, %v1965_v51  ;;  %v3242_v11 = vmax.f32 %v1556_v16, %v3173_v45  ;;  %v1971_v45 = vld [vmem:[%s3390_s0 + $0x70] sm:$0xf] }
  0xbe   :  { %v1111_v28 = vadd.f32 %v1110_v15, %v1109_v62  ;;  %v1201_v10 = vrot.slane %v1195_v55, 2  ;;  %v1203_v13 = vrot.slane %v1196_v50, 2  ;;  %v1301_v63 = vsel %vm36_vm0, %v1300_v34, %v1299_v41 }
  0xbf   :  { %v1303_v26 = vrot.slane %v1301_v63, 4  ;;  %v1304_v25 = vsel %vm36_vm0, %v1302_v53, %v1300_v34  ;;  %v1309_v40 = vrot.slane %v1301_v63, 3  ;;  %v1958_v19 = vmin.u32 %v3195_v9, %v1390_v8  ;;  %v1974_v63 = vld [vmem:[%s3390_s0 + $0x88] sm:$0xf] }
  0xc0   :  { %1897 = vst.msk [vmem:[%s3391_s1 + $0x2] sm:$0x1] %vm418_vm14, %v1111_v28  ;;  %v1202_v3 = vsel %vm67_vm2, %v1200_v43, %v1201_v10  ;;  %v1204_v42 = vsel %vm67_vm2, %v1201_v10, %v1203_v13  ;;  %v1210_v37 = vmax.f32 %v1190_v5, %v1203_v13  ;;  %v1310_v57 = vrot.slane %v1304_v25, 3 }
  0xc1   :  { %v1208_v20 = vmax.f32 %v1188_v58, %v1202_v3  ;;  %v1209_v47 = vmax.f32 %v1189_v33, %v1204_v42  ;;  %v1305_v4 = vsel %vm36_vm0, %v1303_v26, %v1302_v53  ;;  %v3245_v33 = vmax.f32 %v1557_v32, %v3178_v52 }
  0xc2   :  { %v1311_v27 = vsel %vm46_vm1, %v1309_v40, %v1310_v57  ;;  %v1312_v30 = vrot.slane %v1305_v4, 3  ;;  %v3225_v7 = vmul.u32.u64.low 3435973837, %v1958_v19  ;;  %v3226_v54 = vmul.u32.u64.high 3435973837, %v1958_v19, %v3225_v7 }
  0xc3   :  { %v1211_v0 = vrot.slane %v1208_v20, 4  ;;  %v1213_v35 = vrot.slane %v1209_v47, 4  ;;  %v1317_v18 = vmax.f32 %v1297_v12, %v1311_v27  ;;  %v1468_v36 = vmax.f32 %v1462_v31, %v1968_v60  ;;  %v1980_v31 = vld [vmem:[%s3390_s0 + $0xb8] sm:$0xf] }
  0xc4   :  { %v1313_v2 = vsel %vm46_vm1, %v1310_v57, %v1312_v30  ;;  %v1319_v29 = vmax.f32 %v1299_v41, %v1312_v30  ;;  %v3230_v56 = vmul.u32.u64.low 3435973837, %v3202_v39  ;;  %v3231_v58 = vmul.u32.u64.high 3435973837, %v3202_v39, %v3230_v56 }
  0xc5   :  { %v1212_v61 = vsel %vm36_vm0, %v1211_v0, %v1210_v37  ;;  %v1215_v46 = vsel %vm36_vm0, %v1213_v35, %v1211_v0  ;;  %v1318_v23 = vmax.f32 %v1298_v49, %v1313_v2  ;;  %v1320_v6 = vrot.slane %v1317_v18, 4 }
  0xc6   :  { %v1214_v1 = vrot.slane %v1212_v61, 4  ;;  %v1217_v21 = vmax.f32 %v1208_v20, %v1212_v61  ;;  %v3238_v5 = vmax.f32 %v1209_v47, %v1215_v46  ;;  %v1395_v48 = vshrl.u32 %v3226_v54, 3  ;;  %v1977_v47 = vld [vmem:[%s3390_s0 + $0xa0] sm:$0xf] }
  0xc7   :  { %v1321_v38 = vsel %vm36_vm0, %v1320_v6, %v1319_v29  ;;  %v1322_v12 = vrot.slane %v1318_v23, 4  ;;  %v1406_v34 = vshrl.u32 %v3231_v58, 3  ;;  %vm1389_vm7 = vcmp.lt.s32.totalorder %v3195_v9, 0 }
  0xc8   :  { %v1216_v49 = vsel %vm36_vm0, %v1214_v1, %v1213_v35  ;;  %v1220_v62 = vrot.slane %v1217_v21, 4  ;;  %v1323_v44 = vrot.slane %v1321_v38, 4  ;;  %v1329_v15 = vrot.slane %v1321_v38, 2  ;;  %v1986_v38 = vld [vmem:[%s3390_s0 + $0xe8] sm:$0xf] }
  0xc9   :  { %v3249_v14 = vmax.f32 %v1210_v37, %v1216_v49  ;;  %v1324_v41 = vsel %vm36_vm0, %v1322_v12, %v1320_v6  ;;  %v1396_v43 = vmul.u32 10, %v1395_v48  ;;  %v1222_v52 = vrot.slane %v3238_v5, 4 }
  0xca   :  { %v1325_v16 = vsel %vm36_vm0, %v1323_v44, %v1322_v12  ;;  %v1330_v32 = vrot.slane %v1324_v41, 2  ;;  %v1407_v10 = vmul.u32 10, %v1406_v34  ;;  %v1474_v13 = vmax.f32 %v1468_v36, %v1971_v45  ;;  %v1992_v34 = vld [vmem:[%s3390_s0 + $0x118] sm:$0xf] }
  0xcb   :  { %v1221_v53 = vsel %vm36_vm0, %v1220_v62, %v3249_v14  ;;  %v1332_v55 = vrot.slane %v1325_v16, 2  ;;  %v1397_v50 = vsub.s32 %v1958_v19, %v1396_v43  ;;  %v1224_v40 = vsel %vm36_vm0, %v1222_v52, %v1220_v62 }
  0xcc   :  { %v1223_v8 = vrot.slane %v1221_v53, 4  ;;  %v1331_v28 = vsel %vm67_vm2, %v1329_v15, %v1330_v32  ;;  %v1480_v37 = vmax.f32 %v1474_v13, %v1974_v63  ;;  %v1408_v20 = vsub.s32 %v3202_v39, %v1407_v10  ;;  %v1989_v15 = vld [vmem:[%s3390_s0 + $0x100] sm:$0xf] }
  0xcd   :  { %v1333_v17 = vsel %vm67_vm2, %v1330_v32, %v1332_v55  ;;  %v1337_v24 = vmax.f32 %v1317_v18, %v1331_v28  ;;  %v1339_v26 = vmax.f32 %v1319_v29, %v1332_v55  ;;  %v1398_v25 = vsub.s32 0, %v1397_v50 }
  0xce   :  { %v1338_v3 = vmax.f32 %v1318_v23, %v1333_v17  ;;  %v1225_v42 = vsel %vm36_vm0, %v1223_v8, %v1222_v52  ;;  %v1567_v4 = vrot.slane %v3245_v33, 4  ;;  %v1230_v59 = vrot.slane %v1224_v40, 2  ;;  %v1983_v23 = vld [vmem:[%s3390_s0 + $0xd0] sm:$0xf] }
  0xcf   :  { %v1340_v19 = vrot.slane %v1337_v24, 4  ;;  %v1399_v51 = vsel %vm1389_vm7, %v1398_v25, %v1397_v50  ;;  %v1565_v30 = vrot.slane %v3242_v11, 4  ;;  %v1232_v7 = vrot.slane %v1225_v42, 2 }
  0xd0   :  { %v1342_v57 = vrot.slane %v1338_v3, 4  ;;  %vm1412_vm3 = vcmp.ne.s32.totalorder %v1399_v51, 0  ;;  %vm1415_vm8 = vcmp.lt.s32.totalorder %v1399_v51, 0  ;;  %v1486_v39 = vmax.f32 %v1480_v37, %v1977_v47 }
  0xd1   :  { %v1341_v27 = vsel %vm36_vm0, %v1340_v19, %v1339_v26  ;;  %vm1413_vm9 = vcmp.ne.s32.totalorder %v1408_v20, 0  ;;  %v3287_v56 = vsel %vm36_vm0, %v1567_v4, %v1565_v30  ;;  %vm1416_vm12 = vcmp.lt.s32.totalorder %v1408_v20, 0  ;;  %vm3292_vm13 = vmand %vm1415_vm8, %vm1412_vm3 }
  0xd2   :  { %v1343_v54 = vrot.slane %v1341_v27, 4  ;;  %v1344_v0 = vsel %vm36_vm0, %v1342_v57, %v1340_v19  ;;  %v1346_v35 = vmax.f32 %v1337_v24, %v1341_v27  ;;  %v1421_v46 = vadd.s32 10, %v1399_v51  ;;  %vm3301_vm15 = vmand %vm1416_vm12, %vm1413_vm9  ;;  %v2001_v24 = vld [vmem:[%s3390_s0 + $0x160] sm:$0xf]  ;;  %v2004_v19 = vld [vmem:[%s3390_s0 + $0x178] sm:$0xf] }
  0xd3   :  { %v1347_v18 = vmax.f32 %v1338_v3, %v1344_v0  ;;  %v1492_v60 = vmax.f32 %v1486_v39, %v1980_v31  ;;  %v1422_v48 = vadd.s32 10, %v1408_v20  ;;  %v1233_v44 = vsel %vm67_vm2, %v1230_v59, %v1232_v7  ;;  %v2010_v59 = vld [vmem:[%s3390_s0 + $0x1a8] sm:$0xf]  ;;  %v2016_v39 = vld [vmem:[%s3390_s0 + $0x1d8] sm:$0xf] }
  0xd4   :  { %v1345_v2 = vsel %vm36_vm0, %v1343_v54, %v1342_v57  ;;  %v1349_v29 = vrot.slane %v1346_v35, 4  ;;  %v1424_v41 = vsel %vm3292_vm13, %v1421_v46, %v1399_v51  ;;  %v1239_v52 = vmax.f32 %v3249_v14, %v1232_v7  ;;  %v1995_v14 = vld [vmem:[%s3390_s0 + $0x130] sm:$0xf]  ;;  %v2013_v54 = vld [vmem:[%s3390_s0 + $0x1c0] sm:$0xf] }
  0xd5   :  { %v1348_v58 = vmax.f32 %v1339_v26, %v1345_v2  ;;  %v1351_v61 = vrot.slane %v1347_v18, 4  ;;  %v1498_v62 = vmax.f32 %v1492_v60, %v1983_v23  ;;  %v1425_v32 = vsel %vm3301_vm15, %v1422_v48, %v1408_v20  ;;  %v2007_v51 = vld [vmem:[%s3390_s0 + $0x190] sm:$0xf] }
  0xd6   :  { %v1238_v53 = vmax.f32 %v3238_v5, %v1233_v44  ;;  %vm1376_vm4 = vcmp.ge.s32.totalorder %v3195_v9, 0  ;;  %vm1427_vm5 = vcmp.eq.s32.totalorder %v1424_v41, 0  ;;  %vm1428_vm6 = vcmp.eq.s32.totalorder %v1425_v32, 0  ;;  %v1998_v5 = vld [vmem:[%s3390_s0 + $0x148] sm:$0xf] }
  0xd7   :  { %v1350_v1 = vsel %vm36_vm0, %v1349_v29, %v1348_v58  ;;  %v1353_v21 = vsel %vm36_vm0, %v1351_v61, %v1349_v29  ;;  %v1504_v45 = vmax.f32 %v1498_v62, %v1986_v38  ;;  %vm1430_vm7 = vmand %vm1376_vm4, %vm1427_vm5  ;;  %v3331_v26 = vadd.s32 4294967277, %v3442_v22 }
  0xd8   :  { %v1352_v12 = vrot.slane %v1350_v1, 4  ;;  %v1359_v36 = vrot.slane %v1353_v21, 2  ;;  %v1575_v23 = vrot.slane %v3287_v56, 3  ;;  %vm1621_vm3 = vcmask 1043456  }
  0xd9   :  { %v1510_v55 = vmax.f32 %v1504_v45, %v1989_v15  ;;  %v1674_v20 = vsub.s32 0, %v3331_v26  ;;  %vm1650_vm9 = vcmp.ge.s32.totalorder %v3331_v26, 0 }
  0xda   :  { %v1354_v43 = vsel %vm36_vm0, %v1352_v12, %v1351_v61 }
  0xdb   :  { %v1361_v16 = vrot.slane %v1354_v43, 2  ;;  %v1516_v10 = vmax.f32 %v1510_v55, %v1992_v34  ;;  %v2020_v0 = vmin.u32 %v3331_v26, %v1674_v20 }
  0xdd   :  { %v1362_v50 = vsel %vm67_vm2, %v1359_v36, %v1361_v16  ;;  %v1368_v8 = vmax.f32 %v1348_v58, %v1361_v16  ;;  %v1522_v9 = vmax.f32 %v1516_v10, %v1995_v14 }
  0xde   :  { %v1367_v28 = vmax.f32 %v1347_v18, %v1362_v50  ;;  %v3352_v29 = vmul.u32.u64.low 3435973837, %v2020_v0  ;;  %v3353_v58 = vmul.u32.u64.high 3435973837, %v2020_v0, %v3352_v29 }
  0xdf   :  { %v1371_v13 = vadd.f32 %v1368_v8, %v1239_v52  ;;  %v1528_v3 = vmax.f32 %v1522_v9, %v1998_v5 }
  0xe0   :  { %v1370_v63 = vadd.f32 %v1367_v28, %v1238_v53  ;;  %v1679_v49 = vshrl.u32 %v3353_v58, 4 }
  0xe1   :  { %v1434_v17 = vsel %vm1428_vm6, %v1371_v13, 0.0  ;;  %v1534_v57 = vmax.f32 %v1528_v3, %v2001_v24 }
  0xe2   :  { %v1433_v25 = vsel %vm1430_vm7, %v1370_v63, 0.0  ;;  %v1438_v40 = vsel %vm409_vm10, %v1434_v17, 0.0  ;;  %v1680_v45 = vmul.u32 20, %v1679_v49 }
  0xe3   :  { %v1436_v42 = vsel %vm405_vm11, %v1433_v25, 0.0  ;;  %v1540_v47 = vmax.f32 %v1534_v57, %v2004_v19 }
  0xe4   :  { %v1439_v37 = vadd.f32 %v1438_v40, %v1436_v42  ;;  %v1681_v34 = vsub.s32 %v2020_v0, %v1680_v45 }
  0xe5   :  { %v1546_v7 = vmax.f32 %v1540_v47, %v2007_v51 }
  0xe6   :  { %v1440_v22 = vrot.slane %v1439_v37, 4  ;;  %v1682_v10 = vsub.s32 0, %v1681_v34 }
  0xe7   :  { %v1552_v18 = vmax.f32 %v1546_v7, %v2010_v59 }
  0xe8   :  { %v1441_v27 = vadd.f32 %v1440_v22, %v1439_v37 }
  0xe9   :  { %v1558_v2 = vmax.f32 %v1552_v18, %v2013_v54 }
  0xea   :  { %v1442_v35 = vrot.slane %v1441_v27, 2 }
  0xeb   :  { %v1564_v46 = vmax.f32 %v1558_v2, %v2016_v39 }
  0xec   :  { %v1443_v31 = vadd.f32 %v1442_v35, %v1441_v27 }
  0xed   :  { %v1566_v60 = vsel %vm36_vm0, %v1565_v30, %v1564_v46 }
  0xee   :  { %v1444_v61 = vrot.slane %v1443_v31, 1  ;;  %v1568_v1 = vrot.slane %v1566_v60, 4  ;;  %v1574_v21 = vrot.slane %v1566_v60, 3 }
  0xf0   :  { %v1445_v6 = vadd.f32 %v1444_v61, %v1443_v31  ;;  %v1570_v48 = vsel %vm36_vm0, %v1568_v1, %v1567_v4  ;;  %v1576_v38 = vsel %vm46_vm1, %v1574_v21, %v1575_v23 }
  0xf1   :  { %v1577_v12 = vrot.slane %v1570_v48, 3  ;;  %v1582_v56 = vmax.f32 %v3242_v11, %v1576_v38 }
  0xf2   :  { %1959 = vst.msk [vmem:[%s3391_s1 + $0x3] sm:$0x1] %vm418_vm14, %v1445_v6 }
  0xf3   :  { %v1578_v30 = vsel %vm46_vm1, %v1575_v23, %v1577_v12  ;;  %v1584_v62 = vmax.f32 %v1564_v46, %v1577_v12  ;;  %v1585_v44 = vrot.slane %v1582_v56, 4  ;;  %vm1673_vm1 = vcmp.lt.s32.totalorder %v3331_v26, 0 }
  0xf4   :  { %v1583_v36 = vmax.f32 %v3245_v33, %v1578_v30  ;;  %v1683_v24 = vsel %vm1673_vm1, %v1682_v10, %v1681_v34 }
  0xf5   :  { %v1586_v41 = vsel %vm36_vm0, %v1585_v44, %v1584_v62  ;;  %vm1689_vm11 = vcmp.lt.s32.totalorder %v1683_v24, 0  ;;  %v1695_v20 = vadd.s32 20, %v1683_v24 }
  0xf6   :  { %v1587_v15 = vrot.slane %v1583_v36, 4  ;;  %v1588_v43 = vrot.slane %v1586_v41, 4  ;;  %v1594_v52 = vrot.slane %v1586_v41, 2 }
  0xf8   :  { %v1589_v4 = vsel %vm36_vm0, %v1587_v15, %v1585_v44  ;;  %v1590_v16 = vsel %vm36_vm0, %v1588_v43, %v1587_v15 }
  0xf9   :  { %v1595_v32 = vrot.slane %v1589_v4, 2  ;;  %v1597_v11 = vrot.slane %v1590_v16, 2 }
  0xfb   :  { %v1596_v53 = vsel %vm67_vm2, %v1594_v52, %v1595_v32  ;;  %v1598_v55 = vsel %vm67_vm2, %v1595_v32, %v1597_v11  ;;  %v1604_v50 = vmax.f32 %v1584_v62, %v1597_v11  ;;  %vm1686_vm2 = vcmp.ne.s32.totalorder %v1683_v24, 0 }
  0xfc   :  { %v1602_v8 = vmax.f32 %v1582_v56, %v1596_v53  ;;  %v1603_v33 = vmax.f32 %v1583_v36, %v1598_v55  ;;  %vm1692_vm8 = vmand %vm1689_vm11, %vm1686_vm2 }
  0xfd   :  { %v1698_v54 = vsel %vm1692_vm8, %v1695_v20, %v1683_v24 }
  0xfe   :  { %v1605_v14 = vrot.slane %v1602_v8, 4  ;;  %v1607_v28 = vrot.slane %v1603_v33, 4  ;;  %vm1701_vm12 = vcmp.eq.s32.totalorder %v1698_v54, 0 }
  0xff   :  { %vm1704_vm13 = vmand %vm1650_vm9, %vm1701_vm12 }
 0x100   :  { %v1606_v13 = vsel %vm36_vm0, %v1605_v14, %v1604_v50  ;;  %v1609_v5 = vsel %vm36_vm0, %v1607_v28, %v1605_v14 }
 0x101   :  { %v1608_v63 = vrot.slane %v1606_v13, 4  ;;  %v1611_v9 = vmax.f32 %v1602_v8, %v1606_v13  ;;  %v1612_v17 = vmax.f32 %v1603_v33, %v1609_v5 }
 0x103   :  { %v1610_v25 = vsel %vm36_vm0, %v1608_v63, %v1607_v28  ;;  %v1614_v40 = vrot.slane %v1611_v9, 4  ;;  %v1615_v3 = vrot.slane %v1612_v17, 4 }
 0x104   :  { %v1613_v42 = vmax.f32 %v1604_v50, %v1610_v25 }
 0x105   :  { %v1617_v19 = vsel %vm36_vm0, %v1615_v3, %v1614_v40 }
 0x106   :  { %v1616_v37 = vsel %vm36_vm0, %v1614_v40, %v1613_v42  ;;  %v1625_v57 = vrot.slane %v1617_v19, 4 }
 0x107   :  { %v1623_v51 = vrot.slane %v1616_v37, 4 }
 0x108   :  { %v1632_v22 = vmax.f32 %v1613_v42, %v1625_v57 }
 0x109   :  { %v1624_v47 = vsel %vm1621_vm3, %v1615_v3, %v1623_v51  ;;  %v1626_v59 = vsel %vm1621_vm3, %v1623_v51, %v1625_v57 }
 0x10a   :  { %v1630_v27 = vmax.f32 %v1611_v9, %v1624_v47  ;;  %v1631_v7 = vmax.f32 %v1612_v17, %v1626_v59 }
 0x10c   :  { %v1633_v0 = vrot.slane %v1630_v27, 4  ;;  %v1635_v35 = vrot.slane %v1631_v7, 4 }
 0x10e   :  { %v1634_v18 = vsel %vm36_vm0, %v1633_v0, %v1632_v22 }
 0x10f   :  { %v1636_v39 = vrot.slane %v1634_v18, 4 }
 0x111   :  { %v1638_v31 = vsel %vm36_vm0, %v1636_v39, %v1635_v35 }
 0x112   :  { %v1641_v2 = vmax.f32 %v1632_v22, %v1638_v31 }
 0x114   :  { %v1707_v29 = vsel %vm1704_vm13, %v1641_v2, 0.0 }
 0x115   :  { %v1711_v58 = vsel %vm409_vm10, %v1707_v29, 0.0 }
 0x116   :  { %v1713_v61 = vrot.slane %v1711_v58, 4 }
 0x118   :  { %v1714_v46 = vadd.f32 %v1713_v61, %v1711_v58 }
 0x11a   :  { %v1715_v23 = vrot.slane %v1714_v46, 2 }
 0x11c   :  { %v1716_v6 = vadd.f32 %v1715_v23, %v1714_v46 }
 0x11e   :  { %v1717_v60 = vrot.slane %v1716_v6, 1 }
 0x120   :  { %v1718_v1 = vadd.f32 %v1717_v60, %v1716_v6 }
 0x122   :  { %2021 = vst.msk [vmem:[%s3391_s1 + $0x4] sm:$0x1] %vm418_vm14, %v1718_v1 }

</bundles_post_ra>
